<compile_context>
chip_gen: v5e
topology: v5e:2x2
jax: 0.10.0
libtpu: 0.0.40
codegen_flags: <defaults>
</compile_context>

<pallas_src>
import jax
import jax.numpy as jnp
from jax.experimental import pallas as pl
from jax.experimental.pallas import tpu as pltpu

LANE = 128     # TPU lane width; H and V are padded to multiples of this.
STEPS = 8      # time steps fused per grid iteration of the recurrence kernel.


def _round_up(x, m):
    return (x + m - 1) // m * m


def _vmem_limit(nbytes):
    return int(min(100 * 1024 * 1024, max(16 * 1024 * 1024, 2 * nbytes)))


# --------------------------- kernel 1: GRU recurrence ---------------------------

def gru_recurrence_kernel(x_ref,      # (STEPS, Hp) bf16  pre-gathered embedding rows
                          h0_ref,     # (1, Hp)     f32   initial hidden
                          wih_ref,    # (Hp, 3Hp)   bf16  fused input->gate weights (r|z|n)
                          whh_ref,    # (Hp, 3Hp)   bf16  fused hidden->gate weights
                          bih_ref,    # (1, 3Hp)    f32
                          bhh_ref,    # (1, 3Hp)    f32
                          hseq_ref,   # (STEPS, Hp) f32   per-step hidden states (out)
                          h_sc):      # (1, Hp)     f32   hidden carry (scratch)
    Hp = h0_ref.shape[-1]

    @pl.when(pl.program_id(0) == 0)
    def _():
        h_sc[...] = h0_ref[...]

    # relu(embedding) and the recurrence-independent GRU input matmul for the
    # whole chunk: one MXU push at M=STEPS instead of one per step.
    x = jnp.maximum(x_ref[...], 0)                                   # bf16
    gi = jnp.dot(x, wih_ref[...],
                 preferred_element_type=jnp.float32) + bih_ref[...]  # (STEPS, 3Hp) f32

    whh = whh_ref[...]
    bhh = bhh_ref[...]
    h = h_sc[...]                                                    # (1, Hp) f32

    rows = []
    for s in range(x_ref.shape[0]):                                  # static unroll
        gh = jnp.dot(h.astype(jnp.bfloat16), whh,
                     preferred_element_type=jnp.float32) + bhh       # (1, 3Hp) f32
        gi_s = gi[s:s + 1, :]
        # Hp is a multiple of 128 -> these gate slices are lane-aligned (VPU/EUP only).
        r = jax.nn.sigmoid(gi_s[:, 0:Hp] + gh[:, 0:Hp])
        z = jax.nn.sigmoid(gi_s[:, Hp:2 * Hp] + gh[:, Hp:2 * Hp])
        n = jnp.tanh(gi_s[:, 2 * Hp:3 * Hp] + r * gh[:, 2 * Hp:3 * Hp])
        h = (1.0 - z) * n + z * h                                    # f32 gate math (v5e-safe)
        rows.append(h)

    h_sc[...] = h
    hseq_ref[...] = jnp.concatenate(rows, axis=0)   # one sublane-dense (STEPS, Hp) store


# ----------------- kernel 2: batched projection + log-softmax -----------------

def proj_logsoftmax_kernel(h_ref,      # (TM, Hp) f32
                           wout_ref,   # (Hp, Vp) bf16
                           bout_ref,   # (1, Vp)  f32 (pad columns = -1e30)
                           logp_ref):  # (TM, Vp) f32
    logits = jnp.dot(h_ref[...].astype(jnp.bfloat16), wout_ref[...],
                     preferred_element_type=jnp.float32) + bout_ref[...]
    m = jnp.max(logits, axis=-1, keepdims=True)
    shifted = logits - m
    lse = jnp.log(jnp.sum(jnp.exp(shifted), axis=-1, keepdims=True))
    logp_ref[...] = shifted - lse


# --------------------------------- parameters ---------------------------------

def make_params(hidden_size, output_size, seed=0):
    H, V = hidden_size, output_size
    Hp = _round_up(max(H, LANE), LANE)
    Vp = _round_up(max(V, LANE), LANE)
    key = jax.random.PRNGKey(seed)
    ks = jax.random.split(key, 7)
    k = float(1.0 / (hidden_size ** 0.5))

    # Logical (unpadded) parameters; matmul operands stored bf16, biases f32.
    emb = jax.random.normal(ks[0], (V, H), jnp.float32).astype(jnp.bfloat16)
    wih = jax.random.uniform(ks[1], (H, 3 * H), jnp.float32, -k, k).astype(jnp.bfloat16)
    whh = jax.random.uniform(ks[2], (H, 3 * H), jnp.float32, -k, k).astype(jnp.bfloat16)
    bih = jax.random.uniform(ks[3], (1, 3 * H), jnp.float32, -k, k)
    bhh = jax.random.uniform(ks[4], (1, 3 * H), jnp.float32, -k, k)
    wout = jax.random.uniform(ks[5], (H, V), jnp.float32, -k, k).astype(jnp.bfloat16)
    bout = jax.random.uniform(ks[6], (1, V), jnp.float32, -k, k)

    # Padded copies used by the kernels. Each fused gate occupies its own
    # Hp-wide lane-aligned block; padding is mathematically a no-op (pad lanes
    # of h stay exactly 0 through the recurrence).
    def pad_gate_w(w):
        wp = jnp.zeros((Hp, 3 * Hp), jnp.bfloat16)
        for g in range(3):
            wp = wp.at[:H, g * Hp:g * Hp + H].set(w[:, g * H:(g + 1) * H])
        return wp

    def pad_gate_b(b):
        bp = jnp.zeros((1, 3 * Hp), jnp.float32)
        for g in range(3):
            bp = bp.at[:, g * Hp:g * Hp + H].set(b[:, g * H:(g + 1) * H])
        return bp

    emb_p = jnp.zeros((V, Hp), jnp.bfloat16).at[:, :H].set(emb)
    wih_p = pad_gate_w(wih)
    whh_p = pad_gate_w(whh)
    bih_p = pad_gate_b(bih)
    bhh_p = pad_gate_b(bhh)
    wout_p = jnp.zeros((Hp, Vp), jnp.bfloat16).at[:H, :V].set(wout)
    # Padded vocab columns get a huge negative bias so they drop out of the
    # log-softmax (exp underflows to 0) without an in-kernel mask.
    bout_p = jnp.full((1, Vp), -1e30, jnp.float32).at[:, :V].set(bout)

    return dict(H=H, V=V, Hp=Hp, Vp=Vp,
                emb=emb, wih=wih, whh=whh, bih=bih, bhh=bhh, wout=wout, bout=bout,
                emb_p=emb_p, wih_p=wih_p, whh_p=whh_p, bih_p=bih_p, bhh_p=bhh_p,
                wout_p=wout_p, bout_p=bout_p)


# ----------------------------------- wrappers -----------------------------------

def decoder_decode(token_ids, hidden, params):
    """Fused multi-step decode (teacher-forced token ids).

    token_ids: (T,) int; hidden: (1, 1, H).
    Returns (logp (T, V) f32, hidden (1, 1, H) f32).
    """
    H, V, Hp, Vp = params["H"], params["V"], params["Hp"], params["Vp"]
    T = int(token_ids.shape[0])
    T_pad = _round_up(T, STEPS)
    n_chunks = T_pad // STEPS

    tok = jnp.zeros((T_pad,), jnp.int32).at[:T].set(token_ids.astype(jnp.int32))
    # Pre-gather all embedding rows once (one contiguous, pipelined DMA into
    # the kernel instead of T tiny per-step row gathers).
    x = jnp.take(params["emb_p"], tok, axis=0)                       # (T_pad, Hp) bf16
    h0 = jnp.zeros((1, Hp), jnp.float32).at[:, :H].set(
        hidden.reshape(1, H).astype(jnp.float32))

    inv = dict(pipeline_mode=pl.Buffered(1))   # invariant operands: single buffer

    # ---- pass 1: sequential recurrence (hidden carry in VMEM scratch) ----
    rec_bytes = (2 * STEPS * Hp * 2 + Hp * 4 + 2 * Hp * 3 * Hp * 2
                 + 2 * 3 * Hp * 4 + 2 * STEPS * Hp * 4 + Hp * 4)
    hseq = pl.pallas_call(
        gru_recurrence_kernel,
        out_shape=jax.ShapeDtypeStruct((T_pad, Hp), jnp.float32),
        grid=(n_chunks,),
        in_specs=[
            pl.BlockSpec((STEPS, Hp), lambda i: (i, 0)),                 # x chunk
            pl.BlockSpec((1, Hp), lambda i: (0, 0), **inv),              # h0
            pl.BlockSpec((Hp, 3 * Hp), lambda i: (0, 0), **inv),         # wih (resident)
            pl.BlockSpec((Hp, 3 * Hp), lambda i: (0, 0), **inv),         # whh (resident)
            pl.BlockSpec((1, 3 * Hp), lambda i: (0, 0), **inv),          # bih
            pl.BlockSpec((1, 3 * Hp), lambda i: (0, 0), **inv),          # bhh
        ],
        out_specs=pl.BlockSpec((STEPS, Hp), lambda i: (i, 0)),
        scratch_shapes=[pltpu.VMEM((1, Hp), jnp.float32)],               # hidden carry
        compiler_params=pltpu.CompilerParams(
            dimension_semantics=("arbitrary",),      # must stay sequential (h carry)
            vmem_limit_bytes=_vmem_limit(rec_bytes)),
        cost_estimate=pl.CostEstimate(
            flops=int(4 * T_pad * Hp * 3 * Hp + 12 * T_pad * Hp),
            transcendentals=int(3 * T_pad * Hp),
            bytes_accessed=int(T_pad * Hp * 2 + 2 * Hp * 3 * Hp * 2
                               + T_pad * Hp * 4 + Hp * 4)),
    )(x, h0, params["wih_p"], params["whh_p"], params["bih_p"], params["bhh_p"])

    # ---- pass 2: batched vocab projection + log-softmax, parallel over T ----
    tm = min(T_pad, 128)
    if T_pad % tm:
        tm = STEPS
    proj_bytes = 2 * tm * Hp * 4 + Hp * Vp * 2 + Vp * 4 + 2 * tm * Vp * 4
    logp_p = pl.pallas_call(
        proj_logsoftmax_kernel,
        out_shape=jax.ShapeDtypeStruct((T_pad, Vp), jnp.float32),
        grid=(T_pad // tm,),
        in_specs=[
            pl.BlockSpec((tm, Hp), lambda i: (i, 0)),                    # hidden states
            pl.BlockSpec((Hp, Vp), lambda i: (0, 0), **inv),             # wout (resident)
            pl.BlockSpec((1, Vp), lambda i: (0, 0), **inv),              # bout
        ],
        out_specs=pl.BlockSpec((tm, Vp), lambda i: (i, 0)),
        compiler_params=pltpu.CompilerParams(
            dimension_semantics=("parallel",),
            vmem_limit_bytes=_vmem_limit(proj_bytes)),
        cost_estimate=pl.CostEstimate(
            flops=int(2 * T_pad * Hp * Vp + 4 * T_pad * Vp),
            transcendentals=int(T_pad * (Vp + 1)),
            bytes_accessed=int(T_pad * Hp * 4 + Hp * Vp * 2 + Vp * 4
                               + T_pad * Vp * 4)),
    )(hseq, params["wout_p"], params["bout_p"])

    logp = logp_p[:T, :V]
    h_T = hseq[T - 1, :H].reshape(1, 1, H)
    return logp, h_T


def decoder_forward(token_id, hidden, params):
    """Single-step forward matching DecoderModel.forward.

    token_id: scalar int; hidden: (1, 1, H). Returns (logp (1, V), hidden (1, 1, H)).
    """
    token_ids = jnp.asarray(token_id, jnp.int32).reshape(1)
    return decoder_decode(token_ids, hidden, params)


# ----------------------------- pure-JAX reference -----------------------------
# Uses the logical (unpadded) bf16 weights with the identical casts, so the
# check also validates the padding plumbing.
# TODO(synk): additionally verify drift against a full-f32 PyTorch-equivalent
# reference at realistic H/V (bf16 weights + f32 MXU accumulation).

def decoder_decode_ref(token_ids, hidden, params):
    H = params["H"]
    h = hidden.reshape(1, H).astype(jnp.float32)
    logps = []
    for t in range(int(token_ids.shape[0])):
        x = jnp.maximum(params["emb"][token_ids[t]].reshape(1, H), 0)
        gi = jnp.dot(x, params["wih"], preferred_element_type=jnp.float32) + params["bih"]
        gh = jnp.dot(h.astype(jnp.bfloat16), params["whh"],
                     preferred_element_type=jnp.float32) + params["bhh"]
        r = jax.nn.sigmoid(gi[:, 0:H] + gh[:, 0:H])
        z = jax.nn.sigmoid(gi[:, H:2 * H] + gh[:, H:2 * H])
        n = jnp.tanh(gi[:, 2 * H:3 * H] + r * gh[:, 2 * H:3 * H])
        h = (1.0 - z) * n + z * h
        logits = jnp.dot(h.astype(jnp.bfloat16), params["wout"],
                         preferred_element_type=jnp.float32) + params["bout"]
        m = jnp.max(logits, axis=1, keepdims=True)
        s = logits - m
        logps.append(s - jnp.log(jnp.sum(jnp.exp(s), axis=1, keepdims=True)))
    return jnp.concatenate(logps, axis=0), h.reshape(1, 1, H)


def decoder_forward_ref(token_id, hidden, params):
    token_ids = jnp.asarray(token_id, jnp.int32).reshape(1)
    return decoder_decode_ref(token_ids, hidden, params)


if __name__ == "__main__":
    hidden_size = 32
    output_size = 64

    params = make_params(hidden_size, output_size, seed=0)
    hidden0 = jnp.zeros((1, 1, hidden_size), jnp.float32)   # _init_hidden()

    # --- single-step forward (matches DecoderModel.forward) ---
    token_id = jnp.int32(5)
    logp, h_new = decoder_forward(token_id, hidden0, params)
    jax.block_until_ready((logp, h_new))

    logp_ref, h_ref = decoder_forward_ref(token_id, hidden0, params)
    assert logp.shape == (1, output_size) and h_new.shape == (1, 1, hidden_size)
    err = float(jnp.max(jnp.abs(logp - logp_ref)))
    assert err < 2e-3, f"single-step logp mismatch: {err}"
    err = float(jnp.max(jnp.abs(h_new - h_ref)))
    assert err < 2e-3, f"single-step hidden mismatch: {err}"

    # --- fused multi-step decode (T not a multiple of STEPS to exercise padding) ---
    T = 12
    token_ids = jax.random.randint(jax.random.PRNGKey(0), (T,), 0, output_size,
                                   dtype=jnp.int32)
    logps, h_T = decoder_decode(token_ids, hidden0, params)
    jax.block_until_ready((logps, h_T))

    logps_ref, h_T_ref = decoder_decode_ref(token_ids, hidden0, params)
    assert logps.shape == (T, output_size) and h_T.shape == (1, 1, hidden_size)
    err = float(jnp.max(jnp.abs(logps - logps_ref)))
    assert err < 2e-3, f"multi-step logp mismatch: {err}"
    err = float(jnp.max(jnp.abs(h_T - h_T_ref)))
    assert err < 2e-3, f"multi-step hidden mismatch: {err}"

    print("KERNEL_OK")
</pallas_src>

<mosaic_0001>
module attributes {stable_mosaic.version = 11 : i64} {
  func.func @gru_recurrence_kernel(%arg0: i32, %arg1: memref<8x128xbf16, #tpu.memory_space<vmem>>, %arg2: memref<1x128xf32, #tpu.memory_space<vmem>>, %arg3: memref<128x384xbf16, #tpu.memory_space<vmem>>, %arg4: memref<128x384xbf16, #tpu.memory_space<vmem>>, %arg5: memref<1x384xf32, #tpu.memory_space<vmem>>, %arg6: memref<1x384xf32, #tpu.memory_space<vmem>>, %arg7: memref<8x128xf32, #tpu.memory_space<vmem>>, %arg8: memref<1x128xf32, #tpu.memory_space<vmem>>) attributes {dimension_semantics = [#tpu.dimension_semantics<arbitrary>], iteration_bounds = array<i64: 1>, scalar_prefetch = 0 : i64, scratch_operands = 1 : i64, tpu.core_type = #tpu.core_type<tc>, window_params = [{transform_indices = @transform_0, window_bounds = array<i64: 8, 128>}, {pipeline_mode = #tpu.pipeline_mode<synchronous>, transform_indices = @transform_1, window_bounds = array<i64: 1, 128>}, {pipeline_mode = #tpu.pipeline_mode<synchronous>, transform_indices = @transform_2, window_bounds = array<i64: 128, 384>}, {pipeline_mode = #tpu.pipeline_mode<synchronous>, transform_indices = @transform_3, window_bounds = array<i64: 128, 384>}, {pipeline_mode = #tpu.pipeline_mode<synchronous>, transform_indices = @transform_4, window_bounds = array<i64: 1, 384>}, {pipeline_mode = #tpu.pipeline_mode<synchronous>, transform_indices = @transform_5, window_bounds = array<i64: 1, 384>}, {transform_indices = @transform_6, window_bounds = array<i64: 8, 128>}]} {
    %c0_i32 = arith.constant 0 : i32
    %0 = arith.cmpi eq, %arg0, %c0_i32 : i32
    %1 = arith.extui %0 : i1 to i32
    %c0_i32_0 = arith.constant 0 : i32
    %2 = arith.cmpi ne, %1, %c0_i32_0 : i32
    scf.if %2 {
      %c0_49 = arith.constant 0 : index
      %c0_50 = arith.constant 0 : index
      %257 = vector.load %arg2[%c0_49, %c0_50] : memref<1x128xf32, #tpu.memory_space<vmem>>, vector<1x128xf32>
      %c0_51 = arith.constant 0 : index
      %c0_52 = arith.constant 0 : index
      %258 = vector.load %arg8[%c0_51, %c0_52] : memref<1x128xf32, #tpu.memory_space<vmem>>, vector<1x128xf32>
      tpu.vector_store %arg8[%c0_51, %c0_52], %257 {strides = array<i32>} : memref<1x128xf32, #tpu.memory_space<vmem>>, vector<1x128xf32>,
    } else {
    }
    %c0 = arith.constant 0 : index
    %c0_1 = arith.constant 0 : index
    %3 = vector.load %arg1[%c0, %c0_1] : memref<8x128xbf16, #tpu.memory_space<vmem>>, vector<8x128xbf16>
    %cst = arith.constant 0.000000e+00 : bf16
    %4 = vector.broadcast %cst : bf16 to vector<8x128xbf16>
    %5 = arith.maximumf %3, %4 : vector<8x128xbf16>
    %c0_2 = arith.constant 0 : index
    %c0_3 = arith.constant 0 : index
    %6 = vector.load %arg3[%c0_2, %c0_3] : memref<128x384xbf16, #tpu.memory_space<vmem>>, vector<128x384xbf16>
    %cst_4 = arith.constant dense<0.000000e+00> : vector<8x384xf32>
    %7 = tpu.matmul %5, %6, %cst_4 {dimension_numbers = #tpu.dot_dimension_numbers<[1], [0], [0], [1], [0, 0, 1, 1], [], []>} : vector<8x128xbf16>, vector<128x384xbf16>, vector<8x384xf32> -> vector<8x384xf32>
    %c0_5 = arith.constant 0 : index
    %c0_6 = arith.constant 0 : index
    %8 = vector.load %arg5[%c0_5, %c0_6] : memref<1x384xf32, #tpu.memory_space<vmem>>, vector<1x384xf32>
    %9 = vector.broadcast %8 : vector<1x384xf32> to vector<8x384xf32>
    %10 = arith.addf %7, %9 : vector<8x384xf32>
    %c0_7 = arith.constant 0 : index
    %c0_8 = arith.constant 0 : index
    %11 = vector.load %arg4[%c0_7, %c0_8] : memref<128x384xbf16, #tpu.memory_space<vmem>>, vector<128x384xbf16>
    %c0_9 = arith.constant 0 : index
    %c0_10 = arith.constant 0 : index
    %12 = vector.load %arg6[%c0_9, %c0_10] : memref<1x384xf32, #tpu.memory_space<vmem>>, vector<1x384xf32>
    %c0_11 = arith.constant 0 : index
    %c0_12 = arith.constant 0 : index
    %13 = vector.load %arg8[%c0_11, %c0_12] : memref<1x128xf32, #tpu.memory_space<vmem>>, vector<1x128xf32>
    %14 = arith.truncf %13 : vector<1x128xf32> to vector<1x128xbf16>
    %cst_13 = arith.constant dense<0.000000e+00> : vector<1x384xf32>
    %15 = tpu.matmul %14, %11, %cst_13 {dimension_numbers = #tpu.dot_dimension_numbers<[1], [0], [0], [1], [0, 0, 1, 1], [], []>} : vector<1x128xbf16>, vector<128x384xbf16>, vector<1x384xf32> -> vector<1x384xf32>
    %16 = arith.addf %15, %12 : vector<1x384xf32>
    %17 = vector.extract_strided_slice %10 {offsets = [0, 0], sizes = [1, 384], strides = [1, 1]} : vector<8x384xf32> to vector<1x384xf32>
    %18 = vector.extract_strided_slice %17 {offsets = [0, 0], sizes = [1, 128], strides = [1, 1]} : vector<1x384xf32> to vector<1x128xf32>
    %19 = vector.extract_strided_slice %16 {offsets = [0, 0], sizes = [1, 128], strides = [1, 1]} : vector<1x384xf32> to vector<1x128xf32>
    %20 = arith.addf %18, %19 : vector<1x128xf32>
    %21 = arith.negf %20 : vector<1x128xf32>
    %22 = math.exp %21 : vector<1x128xf32>
    %cst_14 = arith.constant 1.000000e+00 : f32
    %23 = vector.broadcast %cst_14 : f32 to vector<1x128xf32>
    %24 = arith.addf %23, %22 : vector<1x128xf32>
    %25 = arith.divf %23, %24 : vector<1x128xf32>
    %26 = vector.extract_strided_slice %17 {offsets = [0, 128], sizes = [1, 128], strides = [1, 1]} : vector<1x384xf32> to vector<1x128xf32>
    %27 = vector.extract_strided_slice %16 {offsets = [0, 128], sizes = [1, 128], strides = [1, 1]} : vector<1x384xf32> to vector<1x128xf32>
    %28 = arith.addf %26, %27 : vector<1x128xf32>
    %29 = arith.negf %28 : vector<1x128xf32>
    %30 = math.exp %29 : vector<1x128xf32>
    %cst_15 = arith.constant 1.000000e+00 : f32
    %31 = vector.broadcast %cst_15 : f32 to vector<1x128xf32>
    %32 = arith.addf %31, %30 : vector<1x128xf32>
    %33 = arith.divf %31, %32 : vector<1x128xf32>
    %34 = vector.extract_strided_slice %17 {offsets = [0, 256], sizes = [1, 128], strides = [1, 1]} : vector<1x384xf32> to vector<1x128xf32>
    %35 = vector.extract_strided_slice %16 {offsets = [0, 256], sizes = [1, 128], strides = [1, 1]} : vector<1x384xf32> to vector<1x128xf32>
    %36 = arith.mulf %25, %35 : vector<1x128xf32>
    %37 = arith.addf %34, %36 : vector<1x128xf32>
    %38 = math.tanh %37 : vector<1x128xf32>
    %cst_16 = arith.constant 1.000000e+00 : f32
    %39 = vector.broadcast %cst_16 : f32 to vector<1x128xf32>
    %40 = arith.subf %39, %33 : vector<1x128xf32>
    %41 = arith.mulf %40, %38 : vector<1x128xf32>
    %42 = arith.mulf %33, %13 : vector<1x128xf32>
    %43 = arith.addf %41, %42 : vector<1x128xf32>
    %44 = arith.truncf %43 : vector<1x128xf32> to vector<1x128xbf16>
    %cst_17 = arith.constant dense<0.000000e+00> : vector<1x384xf32>
    %45 = tpu.matmul %44, %11, %cst_17 {dimension_numbers = #tpu.dot_dimension_numbers<[1], [0], [0], [1], [0, 0, 1, 1], [], []>} : vector<1x128xbf16>, vector<128x384xbf16>, vector<1x384xf32> -> vector<1x384xf32>
    %46 = arith.addf %45, %12 : vector<1x384xf32>
    %47 = vector.extract_strided_slice %10 {offsets = [1, 0], sizes = [1, 384], strides = [1, 1]} : vector<8x384xf32> to vector<1x384xf32>
    %48 = vector.extract_strided_slice %47 {offsets = [0, 0], sizes = [1, 128], strides = [1, 1]} : vector<1x384xf32> to vector<1x128xf32>
    %49 = vector.extract_strided_slice %46 {offsets = [0, 0], sizes = [1, 128], strides = [1, 1]} : vector<1x384xf32> to vector<1x128xf32>
    %50 = arith.addf %48, %49 : vector<1x128xf32>
    %51 = arith.negf %50 : vector<1x128xf32>
    %52 = math.exp %51 : vector<1x128xf32>
    %cst_18 = arith.constant 1.000000e+00 : f32
    %53 = vector.broadcast %cst_18 : f32 to vector<1x128xf32>
    %54 = arith.addf %53, %52 : vector<1x128xf32>
    %55 = arith.divf %53, %54 : vector<1x128xf32>
    %56 = vector.extract_strided_slice %47 {offsets = [0, 128], sizes = [1, 128], strides = [1, 1]} : vector<1x384xf32> to vector<1x128xf32>
    %57 = vector.extract_strided_slice %46 {offsets = [0, 128], sizes = [1, 128], strides = [1, 1]} : vector<1x384xf32> to vector<1x128xf32>
    %58 = arith.addf %56, %57 : vector<1x128xf32>
    %59 = arith.negf %58 : vector<1x128xf32>
    %60 = math.exp %59 : vector<1x128xf32>
    %cst_19 = arith.constant 1.000000e+00 : f32
    %61 = vector.broadcast %cst_19 : f32 to vector<1x128xf32>
    %62 = arith.addf %61, %60 : vector<1x128xf32>
    %63 = arith.divf %61, %62 : vector<1x128xf32>
    %64 = vector.extract_strided_slice %47 {offsets = [0, 256], sizes = [1, 128], strides = [1, 1]} : vector<1x384xf32> to vector<1x128xf32>
    %65 = vector.extract_strided_slice %46 {offsets = [0, 256], sizes = [1, 128], strides = [1, 1]} : vector<1x384xf32> to vector<1x128xf32>
    %66 = arith.mulf %55, %65 : vector<1x128xf32>
    %67 = arith.addf %64, %66 : vector<1x128xf32>
    %68 = math.tanh %67 : vector<1x128xf32>
    %cst_20 = arith.constant 1.000000e+00 : f32
    %69 = vector.broadcast %cst_20 : f32 to vector<1x128xf32>
    %70 = arith.subf %69, %63 : vector<1x128xf32>
    %71 = arith.mulf %70, %68 : vector<1x128xf32>
    %72 = arith.mulf %63, %43 : vector<1x128xf32>
    %73 = arith.addf %71, %72 : vector<1x128xf32>
    %74 = arith.truncf %73 : vector<1x128xf32> to vector<1x128xbf16>
    %cst_21 = arith.constant dense<0.000000e+00> : vector<1x384xf32>
    %75 = tpu.matmul %74, %11, %cst_21 {dimension_numbers = #tpu.dot_dimension_numbers<[1], [0], [0], [1], [0, 0, 1, 1], [], []>} : vector<1x128xbf16>, vector<128x384xbf16>, vector<1x384xf32> -> vector<1x384xf32>
    %76 = arith.addf %75, %12 : vector<1x384xf32>
    %77 = vector.extract_strided_slice %10 {offsets = [2, 0], sizes = [1, 384], strides = [1, 1]} : vector<8x384xf32> to vector<1x384xf32>
    %78 = vector.extract_strided_slice %77 {offsets = [0, 0], sizes = [1, 128], strides = [1, 1]} : vector<1x384xf32> to vector<1x128xf32>
    %79 = vector.extract_strided_slice %76 {offsets = [0, 0], sizes = [1, 128], strides = [1, 1]} : vector<1x384xf32> to vector<1x128xf32>
    %80 = arith.addf %78, %79 : vector<1x128xf32>
    %81 = arith.negf %80 : vector<1x128xf32>
    %82 = math.exp %81 : vector<1x128xf32>
    %cst_22 = arith.constant 1.000000e+00 : f32
    %83 = vector.broadcast %cst_22 : f32 to vector<1x128xf32>
    %84 = arith.addf %83, %82 : vector<1x128xf32>
    %85 = arith.divf %83, %84 : vector<1x128xf32>
    %86 = vector.extract_strided_slice %77 {offsets = [0, 128], sizes = [1, 128], strides = [1, 1]} : vector<1x384xf32> to vector<1x128xf32>
    %87 = vector.extract_strided_slice %76 {offsets = [0, 128], sizes = [1, 128], strides = [1, 1]} : vector<1x384xf32> to vector<1x128xf32>
    %88 = arith.addf %86, %87 : vector<1x128xf32>
    %89 = arith.negf %88 : vector<1x128xf32>
    %90 = math.exp %89 : vector<1x128xf32>
    %cst_23 = arith.constant 1.000000e+00 : f32
    %91 = vector.broadcast %cst_23 : f32 to vector<1x128xf32>
    %92 = arith.addf %91, %90 : vector<1x128xf32>
    %93 = arith.divf %91, %92 : vector<1x128xf32>
    %94 = vector.extract_strided_slice %77 {offsets = [0, 256], sizes = [1, 128], strides = [1, 1]} : vector<1x384xf32> to vector<1x128xf32>
    %95 = vector.extract_strided_slice %76 {offsets = [0, 256], sizes = [1, 128], strides = [1, 1]} : vector<1x384xf32> to vector<1x128xf32>
    %96 = arith.mulf %85, %95 : vector<1x128xf32>
    %97 = arith.addf %94, %96 : vector<1x128xf32>
    %98 = math.tanh %97 : vector<1x128xf32>
    %cst_24 = arith.constant 1.000000e+00 : f32
    %99 = vector.broadcast %cst_24 : f32 to vector<1x128xf32>
    %100 = arith.subf %99, %93 : vector<1x128xf32>
    %101 = arith.mulf %100, %98 : vector<1x128xf32>
    %102 = arith.mulf %93, %73 : vector<1x128xf32>
    %103 = arith.addf %101, %102 : vector<1x128xf32>
    %104 = arith.truncf %103 : vector<1x128xf32> to vector<1x128xbf16>
    %cst_25 = arith.constant dense<0.000000e+00> : vector<1x384xf32>
    %105 = tpu.matmul %104, %11, %cst_25 {dimension_numbers = #tpu.dot_dimension_numbers<[1], [0], [0], [1], [0, 0, 1, 1], [], []>} : vector<1x128xbf16>, vector<128x384xbf16>, vector<1x384xf32> -> vector<1x384xf32>
    %106 = arith.addf %105, %12 : vector<1x384xf32>
    %107 = vector.extract_strided_slice %10 {offsets = [3, 0], sizes = [1, 384], strides = [1, 1]} : vector<8x384xf32> to vector<1x384xf32>
    %108 = vector.extract_strided_slice %107 {offsets = [0, 0], sizes = [1, 128], strides = [1, 1]} : vector<1x384xf32> to vector<1x128xf32>
    %109 = vector.extract_strided_slice %106 {offsets = [0, 0], sizes = [1, 128], strides = [1, 1]} : vector<1x384xf32> to vector<1x128xf32>
    %110 = arith.addf %108, %109 : vector<1x128xf32>
    %111 = arith.negf %110 : vector<1x128xf32>
    %112 = math.exp %111 : vector<1x128xf32>
    %cst_26 = arith.constant 1.000000e+00 : f32
    %113 = vector.broadcast %cst_26 : f32 to vector<1x128xf32>
    %114 = arith.addf %113, %112 : vector<1x128xf32>
    %115 = arith.divf %113, %114 : vector<1x128xf32>
    %116 = vector.extract_strided_slice %107 {offsets = [0, 128], sizes = [1, 128], strides = [1, 1]} : vector<1x384xf32> to vector<1x128xf32>
    %117 = vector.extract_strided_slice %106 {offsets = [0, 128], sizes = [1, 128], strides = [1, 1]} : vector<1x384xf32> to vector<1x128xf32>
    %118 = arith.addf %116, %117 : vector<1x128xf32>
    %119 = arith.negf %118 : vector<1x128xf32>
    %120 = math.exp %119 : vector<1x128xf32>
    %cst_27 = arith.constant 1.000000e+00 : f32
    %121 = vector.broadcast %cst_27 : f32 to vector<1x128xf32>
    %122 = arith.addf %121, %120 : vector<1x128xf32>
    %123 = arith.divf %121, %122 : vector<1x128xf32>
    %124 = vector.extract_strided_slice %107 {offsets = [0, 256], sizes = [1, 128], strides = [1, 1]} : vector<1x384xf32> to vector<1x128xf32>
    %125 = vector.extract_strided_slice %106 {offsets = [0, 256], sizes = [1, 128], strides = [1, 1]} : vector<1x384xf32> to vector<1x128xf32>
    %126 = arith.mulf %115, %125 : vector<1x128xf32>
    %127 = arith.addf %124, %126 : vector<1x128xf32>
    %128 = math.tanh %127 : vector<1x128xf32>
    %cst_28 = arith.constant 1.000000e+00 : f32
    %129 = vector.broadcast %cst_28 : f32 to vector<1x128xf32>
    %130 = arith.subf %129, %123 : vector<1x128xf32>
    %131 = arith.mulf %130, %128 : vector<1x128xf32>
    %132 = arith.mulf %123, %103 : vector<1x128xf32>
    %133 = arith.addf %131, %132 : vector<1x128xf32>
    %134 = arith.truncf %133 : vector<1x128xf32> to vector<1x128xbf16>
    %cst_29 = arith.constant dense<0.000000e+00> : vector<1x384xf32>
    %135 = tpu.matmul %134, %11, %cst_29 {dimension_numbers = #tpu.dot_dimension_numbers<[1], [0], [0], [1], [0, 0, 1, 1], [], []>} : vector<1x128xbf16>, vector<128x384xbf16>, vector<1x384xf32> -> vector<1x384xf32>
    %136 = arith.addf %135, %12 : vector<1x384xf32>
    %137 = vector.extract_strided_slice %10 {offsets = [4, 0], sizes = [1, 384], strides = [1, 1]} : vector<8x384xf32> to vector<1x384xf32>
    %138 = vector.extract_strided_slice %137 {offsets = [0, 0], sizes = [1, 128], strides = [1, 1]} : vector<1x384xf32> to vector<1x128xf32>
    %139 = vector.extract_strided_slice %136 {offsets = [0, 0], sizes = [1, 128], strides = [1, 1]} : vector<1x384xf32> to vector<1x128xf32>
    %140 = arith.addf %138, %139 : vector<1x128xf32>
    %141 = arith.negf %140 : vector<1x128xf32>
    %142 = math.exp %141 : vector<1x128xf32>
    %cst_30 = arith.constant 1.000000e+00 : f32
    %143 = vector.broadcast %cst_30 : f32 to vector<1x128xf32>
    %144 = arith.addf %143, %142 : vector<1x128xf32>
    %145 = arith.divf %143, %144 : vector<1x128xf32>
    %146 = vector.extract_strided_slice %137 {offsets = [0, 128], sizes = [1, 128], strides = [1, 1]} : vector<1x384xf32> to vector<1x128xf32>
    %147 = vector.extract_strided_slice %136 {offsets = [0, 128], sizes = [1, 128], strides = [1, 1]} : vector<1x384xf32> to vector<1x128xf32>
    %148 = arith.addf %146, %147 : vector<1x128xf32>
    %149 = arith.negf %148 : vector<1x128xf32>
    %150 = math.exp %149 : vector<1x128xf32>
    %cst_31 = arith.constant 1.000000e+00 : f32
    %151 = vector.broadcast %cst_31 : f32 to vector<1x128xf32>
    %152 = arith.addf %151, %150 : vector<1x128xf32>
    %153 = arith.divf %151, %152 : vector<1x128xf32>
    %154 = vector.extract_strided_slice %137 {offsets = [0, 256], sizes = [1, 128], strides = [1, 1]} : vector<1x384xf32> to vector<1x128xf32>
    %155 = vector.extract_strided_slice %136 {offsets = [0, 256], sizes = [1, 128], strides = [1, 1]} : vector<1x384xf32> to vector<1x128xf32>
    %156 = arith.mulf %145, %155 : vector<1x128xf32>
    %157 = arith.addf %154, %156 : vector<1x128xf32>
    %158 = math.tanh %157 : vector<1x128xf32>
    %cst_32 = arith.constant 1.000000e+00 : f32
    %159 = vector.broadcast %cst_32 : f32 to vector<1x128xf32>
    %160 = arith.subf %159, %153 : vector<1x128xf32>
    %161 = arith.mulf %160, %158 : vector<1x128xf32>
    %162 = arith.mulf %153, %133 : vector<1x128xf32>
    %163 = arith.addf %161, %162 : vector<1x128xf32>
    %164 = arith.truncf %163 : vector<1x128xf32> to vector<1x128xbf16>
    %cst_33 = arith.constant dense<0.000000e+00> : vector<1x384xf32>
    %165 = tpu.matmul %164, %11, %cst_33 {dimension_numbers = #tpu.dot_dimension_numbers<[1], [0], [0], [1], [0, 0, 1, 1], [], []>} : vector<1x128xbf16>, vector<128x384xbf16>, vector<1x384xf32> -> vector<1x384xf32>
    %166 = arith.addf %165, %12 : vector<1x384xf32>
    %167 = vector.extract_strided_slice %10 {offsets = [5, 0], sizes = [1, 384], strides = [1, 1]} : vector<8x384xf32> to vector<1x384xf32>
    %168 = vector.extract_strided_slice %167 {offsets = [0, 0], sizes = [1, 128], strides = [1, 1]} : vector<1x384xf32> to vector<1x128xf32>
    %169 = vector.extract_strided_slice %166 {offsets = [0, 0], sizes = [1, 128], strides = [1, 1]} : vector<1x384xf32> to vector<1x128xf32>
    %170 = arith.addf %168, %169 : vector<1x128xf32>
    %171 = arith.negf %170 : vector<1x128xf32>
    %172 = math.exp %171 : vector<1x128xf32>
    %cst_34 = arith.constant 1.000000e+00 : f32
    %173 = vector.broadcast %cst_34 : f32 to vector<1x128xf32>
    %174 = arith.addf %173, %172 : vector<1x128xf32>
    %175 = arith.divf %173, %174 : vector<1x128xf32>
    %176 = vector.extract_strided_slice %167 {offsets = [0, 128], sizes = [1, 128], strides = [1, 1]} : vector<1x384xf32> to vector<1x128xf32>
    %177 = vector.extract_strided_slice %166 {offsets = [0, 128], sizes = [1, 128], strides = [1, 1]} : vector<1x384xf32> to vector<1x128xf32>
    %178 = arith.addf %176, %177 : vector<1x128xf32>
    %179 = arith.negf %178 : vector<1x128xf32>
    %180 = math.exp %179 : vector<1x128xf32>
    %cst_35 = arith.constant 1.000000e+00 : f32
    %181 = vector.broadcast %cst_35 : f32 to vector<1x128xf32>
    %182 = arith.addf %181, %180 : vector<1x128xf32>
    %183 = arith.divf %181, %182 : vector<1x128xf32>
    %184 = vector.extract_strided_slice %167 {offsets = [0, 256], sizes = [1, 128], strides = [1, 1]} : vector<1x384xf32> to vector<1x128xf32>
    %185 = vector.extract_strided_slice %166 {offsets = [0, 256], sizes = [1, 128], strides = [1, 1]} : vector<1x384xf32> to vector<1x128xf32>
    %186 = arith.mulf %175, %185 : vector<1x128xf32>
    %187 = arith.addf %184, %186 : vector<1x128xf32>
    %188 = math.tanh %187 : vector<1x128xf32>
    %cst_36 = arith.constant 1.000000e+00 : f32
    %189 = vector.broadcast %cst_36 : f32 to vector<1x128xf32>
    %190 = arith.subf %189, %183 : vector<1x128xf32>
    %191 = arith.mulf %190, %188 : vector<1x128xf32>
    %192 = arith.mulf %183, %163 : vector<1x128xf32>
    %193 = arith.addf %191, %192 : vector<1x128xf32>
    %194 = arith.truncf %193 : vector<1x128xf32> to vector<1x128xbf16>
    %cst_37 = arith.constant dense<0.000000e+00> : vector<1x384xf32>
    %195 = tpu.matmul %194, %11, %cst_37 {dimension_numbers = #tpu.dot_dimension_numbers<[1], [0], [0], [1], [0, 0, 1, 1], [], []>} : vector<1x128xbf16>, vector<128x384xbf16>, vector<1x384xf32> -> vector<1x384xf32>
    %196 = arith.addf %195, %12 : vector<1x384xf32>
    %197 = vector.extract_strided_slice %10 {offsets = [6, 0], sizes = [1, 384], strides = [1, 1]} : vector<8x384xf32> to vector<1x384xf32>
    %198 = vector.extract_strided_slice %197 {offsets = [0, 0], sizes = [1, 128], strides = [1, 1]} : vector<1x384xf32> to vector<1x128xf32>
    %199 = vector.extract_strided_slice %196 {offsets = [0, 0], sizes = [1, 128], strides = [1, 1]} : vector<1x384xf32> to vector<1x128xf32>
    %200 = arith.addf %198, %199 : vector<1x128xf32>
    %201 = arith.negf %200 : vector<1x128xf32>
    %202 = math.exp %201 : vector<1x128xf32>
    %cst_38 = arith.constant 1.000000e+00 : f32
    %203 = vector.broadcast %cst_38 : f32 to vector<1x128xf32>
    %204 = arith.addf %203, %202 : vector<1x128xf32>
    %205 = arith.divf %203, %204 : vector<1x128xf32>
    %206 = vector.extract_strided_slice %197 {offsets = [0, 128], sizes = [1, 128], strides = [1, 1]} : vector<1x384xf32> to vector<1x128xf32>
    %207 = vector.extract_strided_slice %196 {offsets = [0, 128], sizes = [1, 128], strides = [1, 1]} : vector<1x384xf32> to vector<1x128xf32>
    %208 = arith.addf %206, %207 : vector<1x128xf32>
    %209 = arith.negf %208 : vector<1x128xf32>
    %210 = math.exp %209 : vector<1x128xf32>
    %cst_39 = arith.constant 1.000000e+00 : f32
    %211 = vector.broadcast %cst_39 : f32 to vector<1x128xf32>
    %212 = arith.addf %211, %210 : vector<1x128xf32>
    %213 = arith.divf %211, %212 : vector<1x128xf32>
    %214 = vector.extract_strided_slice %197 {offsets = [0, 256], sizes = [1, 128], strides = [1, 1]} : vector<1x384xf32> to vector<1x128xf32>
    %215 = vector.extract_strided_slice %196 {offsets = [0, 256], sizes = [1, 128], strides = [1, 1]} : vector<1x384xf32> to vector<1x128xf32>
    %216 = arith.mulf %205, %215 : vector<1x128xf32>
    %217 = arith.addf %214, %216 : vector<1x128xf32>
    %218 = math.tanh %217 : vector<1x128xf32>
    %cst_40 = arith.constant 1.000000e+00 : f32
    %219 = vector.broadcast %cst_40 : f32 to vector<1x128xf32>
    %220 = arith.subf %219, %213 : vector<1x128xf32>
    %221 = arith.mulf %220, %218 : vector<1x128xf32>
    %222 = arith.mulf %213, %193 : vector<1x128xf32>
    %223 = arith.addf %221, %222 : vector<1x128xf32>
    %224 = arith.truncf %223 : vector<1x128xf32> to vector<1x128xbf16>
    %cst_41 = arith.constant dense<0.000000e+00> : vector<1x384xf32>
    %225 = tpu.matmul %224, %11, %cst_41 {dimension_numbers = #tpu.dot_dimension_numbers<[1], [0], [0], [1], [0, 0, 1, 1], [], []>} : vector<1x128xbf16>, vector<128x384xbf16>, vector<1x384xf32> -> vector<1x384xf32>
    %226 = arith.addf %225, %12 : vector<1x384xf32>
    %227 = vector.extract_strided_slice %10 {offsets = [7, 0], sizes = [1, 384], strides = [1, 1]} : vector<8x384xf32> to vector<1x384xf32>
    %228 = vector.extract_strided_slice %227 {offsets = [0, 0], sizes = [1, 128], strides = [1, 1]} : vector<1x384xf32> to vector<1x128xf32>
    %229 = vector.extract_strided_slice %226 {offsets = [0, 0], sizes = [1, 128], strides = [1, 1]} : vector<1x384xf32> to vector<1x128xf32>
    %230 = arith.addf %228, %229 : vector<1x128xf32>
    %231 = arith.negf %230 : vector<1x128xf32>
    %232 = math.exp %231 : vector<1x128xf32>
    %cst_42 = arith.constant 1.000000e+00 : f32
    %233 = vector.broadcast %cst_42 : f32 to vector<1x128xf32>
    %234 = arith.addf %233, %232 : vector<1x128xf32>
    %235 = arith.divf %233, %234 : vector<1x128xf32>
    %236 = vector.extract_strided_slice %227 {offsets = [0, 128], sizes = [1, 128], strides = [1, 1]} : vector<1x384xf32> to vector<1x128xf32>
    %237 = vector.extract_strided_slice %226 {offsets = [0, 128], sizes = [1, 128], strides = [1, 1]} : vector<1x384xf32> to vector<1x128xf32>
    %238 = arith.addf %236, %237 : vector<1x128xf32>
    %239 = arith.negf %238 : vector<1x128xf32>
    %240 = math.exp %239 : vector<1x128xf32>
    %cst_43 = arith.constant 1.000000e+00 : f32
    %241 = vector.broadcast %cst_43 : f32 to vector<1x128xf32>
    %242 = arith.addf %241, %240 : vector<1x128xf32>
    %243 = arith.divf %241, %242 : vector<1x128xf32>
    %244 = vector.extract_strided_slice %227 {offsets = [0, 256], sizes = [1, 128], strides = [1, 1]} : vector<1x384xf32> to vector<1x128xf32>
    %245 = vector.extract_strided_slice %226 {offsets = [0, 256], sizes = [1, 128], strides = [1, 1]} : vector<1x384xf32> to vector<1x128xf32>
    %246 = arith.mulf %235, %245 : vector<1x128xf32>
    %247 = arith.addf %244, %246 : vector<1x128xf32>
    %248 = math.tanh %247 : vector<1x128xf32>
    %cst_44 = arith.constant 1.000000e+00 : f32
    %249 = vector.broadcast %cst_44 : f32 to vector<1x128xf32>
    %250 = arith.subf %249, %243 : vector<1x128xf32>
    %251 = arith.mulf %250, %248 : vector<1x128xf32>
    %252 = arith.mulf %243, %223 : vector<1x128xf32>
    %253 = arith.addf %251, %252 : vector<1x128xf32>
    %c0_45 = arith.constant 0 : index
    %c0_46 = arith.constant 0 : index
    %254 = vector.load %arg8[%c0_45, %c0_46] : memref<1x128xf32, #tpu.memory_space<vmem>>, vector<1x128xf32>
    tpu.vector_store %arg8[%c0_45, %c0_46], %253 {strides = array<i32>} : memref<1x128xf32, #tpu.memory_space<vmem>>, vector<1x128xf32>,
    %255 = tpu.concatenate %43, %73, %103, %133, %163, %193, %223, %253 in 0 : vector<1x128xf32>, vector<1x128xf32>, vector<1x128xf32>, vector<1x128xf32>, vector<1x128xf32>, vector<1x128xf32>, vector<1x128xf32>, vector<1x128xf32> -> vector<8x128xf32>
    %c0_47 = arith.constant 0 : index
    %c0_48 = arith.constant 0 : index
    %256 = vector.load %arg7[%c0_47, %c0_48] : memref<8x128xf32, #tpu.memory_space<vmem>>, vector<8x128xf32>
    tpu.vector_store %arg7[%c0_47, %c0_48], %255 {strides = array<i32>} : memref<8x128xf32, #tpu.memory_space<vmem>>, vector<8x128xf32>,
    return
  }
  func.func @transform_0(%arg0: i32) -> (i32, i32) {
    %c0_i32 = arith.constant 0 : i32
    %c0_i32_0 = arith.constant 0 : i32
    return %arg0, %c0_i32 : i32, i32
  }
  func.func @transform_1(%arg0: i32) -> (i32, i32) {
    %c0_i32 = arith.constant 0 : i32
    %c0_i32_0 = arith.constant 0 : i32
    %c0_i32_1 = arith.constant 0 : i32
    return %c0_i32, %c0_i32_0 : i32, i32
  }
  func.func @transform_2(%arg0: i32) -> (i32, i32) {
    %c0_i32 = arith.constant 0 : i32
    %c0_i32_0 = arith.constant 0 : i32
    %c0_i32_1 = arith.constant 0 : i32
    return %c0_i32, %c0_i32_0 : i32, i32
  }
  func.func @transform_3(%arg0: i32) -> (i32, i32) {
    %c0_i32 = arith.constant 0 : i32
    %c0_i32_0 = arith.constant 0 : i32
    %c0_i32_1 = arith.constant 0 : i32
    return %c0_i32, %c0_i32_0 : i32, i32
  }
  func.func @transform_4(%arg0: i32) -> (i32, i32) {
    %c0_i32 = arith.constant 0 : i32
    %c0_i32_0 = arith.constant 0 : i32
    %c0_i32_1 = arith.constant 0 : i32
    return %c0_i32, %c0_i32_0 : i32, i32
  }
  func.func @transform_5(%arg0: i32) -> (i32, i32) {
    %c0_i32 = arith.constant 0 : i32
    %c0_i32_0 = arith.constant 0 : i32
    %c0_i32_1 = arith.constant 0 : i32
    return %c0_i32, %c0_i32_0 : i32, i32
  }
  func.func @transform_6(%arg0: i32) -> (i32, i32) {
    %c0_i32 = arith.constant 0 : i32
    %c0_i32_0 = arith.constant 0 : i32
    return %arg0, %c0_i32 : i32, i32
  }
}

</mosaic_0001>

<bundles_post_ra>
// kernel: tpu_custom_call.1
= control target key start
LH: loop header
LB: loop body
LE: loop exit
PB: predicated region body
PF: predicated region fallthrough
CT: control target
= control target key end

     0   :  { %11 = vsyncpa [#allocation4], 0  ;;  %s2252_s0 = inlined_call_operand.hbm [shape: bf16[8,128], index: 0, kind: input, shape index: {}]   ;;  %s2253_s1 = inlined_call_operand.hbm [shape: f32[1,128], index: 1, kind: input, shape index: {}]   ;;  %s2254_s2 = inlined_call_operand.hbm [shape: bf16[128,384], index: 2, kind: input, shape index: {}]   ;;  %s2255_s3 = inlined_call_operand.hbm [shape: bf16[128,384], index: 3, kind: input, shape index: {}]   ;;  %s2256_s4 = inlined_call_operand.vmem [shape: f32[1,384], index: 4, kind: input, shape index: {}]   ;;  %s2257_s5 = inlined_call_operand.hbm [shape: f32[1,384], index: 5, kind: input, shape index: {}]   ;;  %s2258_s6 = inlined_call_operand.hbm [shape: f32[8,128], index: 6, kind: output, shape index: {}]  }
   0x1   :  { %12 = vsyncpa [#allocation7], 0 }
   0x2   :  { %13 = vsyncpa [#allocation10], 0  ;;  %s31_s23 = sshll.u32 %s2253_s1, 4  ;;  %s32_s23 = int_to_ptr.hbm [resolvable:$true] %s31_s23 }
   0x3   :  { %14 = vsyncpa [#allocation5], 0  ;;  %s1816_s24 = smov [#allocation6]   ;;  %s54_s28 = sshll.u32 %s2255_s3, 4  ;;  %s55_s28 = int_to_ptr.hbm [resolvable:$true] %s54_s28 }
   0x4   :  { %s33_s25 = sshll.u32 %s1816_s24, 4  ;;  %s1817_s29 = smov [#allocation9]   ;;  %s34_s25 = int_to_ptr.vmem [resolvable:$true] %s33_s25 }
   0x5   :  { %36 = dma.hbm_to_vmem [thread:$0]  %s32_s23, 16, %s34_s25, [#allocation7]  }
   0x6   :  { %s56_s30 = sshll.u32 %s1817_s29, 4  ;;  %s20_s9 = sshll.u32 %s2252_s0, 4  ;;  %s57_s30 = int_to_ptr.vmem [resolvable:$true] %s56_s30  ;;  %s21_s9 = int_to_ptr.hbm [resolvable:$true] %s20_s9 }
   0x7   :  { %s1818_s1 = smov 192   ;;  %s1819_s10 = smov 12  }
   0x8   :  { %62 = dma.hbm_to_vmem [thread:$0]  %s55_s28, 3072, %s57_s30, [#allocation10], %s1818_s1, %s1818_s1, %s1819_s10  }
   0x9   :  { %s41_s13 = sshll.u32 %s2254_s2, 4  ;;  %s1820_s14 = smov [#allocation3]   ;;  %s42_s13 = int_to_ptr.hbm [resolvable:$true] %s41_s13 }
   0xa   :  { %s22_s15 = sshll.u32 %s1820_s14, 4  ;;  %s1821_s3 = smov [#allocation8]   ;;  %s23_s15 = int_to_ptr.vmem [resolvable:$true] %s22_s15 }
   0xb   :  { %25 = dma.hbm_to_vmem [thread:$0]  %s21_s9, 64, %s23_s15, [#allocation4]  }
   0xc   :  { %s43_s16 = sshll.u32 %s1821_s3, 4  ;;  %s70_s0 = sshll.u32 %s2257_s5, 4  ;;  %s44_s16 = int_to_ptr.vmem [resolvable:$true] %s43_s16  ;;  %s71_s0 = int_to_ptr.hbm [resolvable:$true] %s70_s0 }
   0xd   :  { %49 = dma.hbm_to_vmem [thread:$0]  %s42_s13, 3072, %s44_s16, [#allocation7], %s1818_s1, %s1818_s1, %s1819_s10  }
   0xe   :  { %s1822_s19 = smov [#allocation11]  }
   0xf   :  { %s72_s20 = sshll.u32 %s1822_s19, 4  ;;  %s73_s20 = int_to_ptr.vmem [resolvable:$true] %s72_s20 }
  0x10   :  { %75 = dma.hbm_to_vmem [thread:$0]  %s71_s0, 48, %s73_s20, [#allocation10]  }
  0x11   :  { %1808 = dma.done.wait [#allocation4], 64  }
  0x12   :  { %1809 = vsyncadd [#allocation4], 4294967232 }
  0x13   :  { %1810 = dma.done.wait [#allocation7], 3088  }
  0x14   :  { %1811 = vsyncadd [#allocation7], 4294964208 }
  0x15   :  { %1812 = dma.done.wait [#allocation10], 3120  }
  0x16   :  { %1813 = vsyncadd [#allocation10], 4294964176  ;;  %v1406_v0 = vld [vmem:[#allocation8 + $0xa8] sm:$0xf]  ;;  %v1550_v1 = vld [vmem:[#allocation8 + $0xb0] sm:$0xf0] }
  0x17   :  { %v1502_v2 = vld [vmem:[#allocation9 + $0xa8] sm:$0xf]  ;;  %v1407_v3 = vor.u32 %v1550_v1, %v1406_v0  ;;  %v1574_v4 = vld [vmem:[#allocation9 + $0xb0] sm:$0xf0]  ;;  %v1394_v5 = vld [vmem:[#allocation8 + $0x90] sm:$0xf] }
  0x18   :  { %v1547_v6 = vld [vmem:[#allocation8 + $0x98] sm:$0xf0]  ;;  %v1874_v7 = vor.u32 %v1574_v4, %v1502_v2  ;;  %v1490_v8 = vld [vmem:[#allocation9 + $0x90] sm:$0xf]  ;;  %v1549_v10 = vld [vmem:[#allocation8 + $0xac] sm:$0xf] }
  0x19   :  { %v1571_v9 = vld [vmem:[#allocation9 + $0x98] sm:$0xf0]  ;;  %274 = vmatpush.bf16.msra.mxu0 %v1407_v3  ;;  %v1395_v11 = vor.u32 %v1547_v6, %v1394_v5  ;;  %v1408_v12 = vld [vmem:[#allocation8 + $0xb4] sm:$0xf0]  ;;  %v1544_v16 = vld [vmem:[#allocation8 + $0x80] sm:$0xf0] }
  0x1a   :  { %483 = vmatpush.bf16.msra.mxu3 %v1874_v7  ;;  %v1877_v13 = vor.u32 %v1571_v9, %v1490_v8  ;;  %v1411_v14 = vor.u32 %v1549_v10, %v1408_v12  ;;  %v1382_v15 = vld [vmem:[#allocation8 + $0x78] sm:$0xf]  ;;  %v1546_v17 = vld [vmem:[#allocation8 + $0x94] sm:$0xf]  ;;  %v1568_v19 = vld [vmem:[#allocation9 + $0x80] sm:$0xf0] }
  0x1b   :  { %v1478_v18 = vld [vmem:[#allocation9 + $0x78] sm:$0xf]  ;;  %v1396_v20 = vld [vmem:[#allocation8 + $0x9c] sm:$0xf0]  ;;  %v1383_v22 = vor.u32 %v1544_v16, %v1382_v15  ;;  %v1543_v23 = vld [vmem:[#allocation8 + $0x7c] sm:$0xf] }
  0x1c   :  { %287 = vmatpush.bf16.msra.mxu1 %v1411_v14  ;;  %v1399_v21 = vor.u32 %v1546_v17, %v1396_v20  ;;  %v1384_v24 = vld [vmem:[#allocation8 + $0x84] sm:$0xf0]  ;;  %v1880_v25 = vor.u32 %v1568_v19, %v1478_v18  ;;  %v1370_v26 = vld [vmem:[#allocation8 + $0x60] sm:$0xf]  ;;  %v1541_v27 = vld [vmem:[#allocation8 + $0x68] sm:$0xf0] }
  0x1d   :  { %275 = vmatpush.bf16.msra.mxu0 %v1395_v11  ;;  %v1466_v28 = vld [vmem:[#allocation9 + $0x60] sm:$0xf]  ;;  %v1565_v29 = vld [vmem:[#allocation9 + $0x68] sm:$0xf0]  ;;  %v1387_v30 = vor.u32 %v1543_v23, %v1384_v24  ;;  %v1371_v31 = vor.u32 %v1541_v27, %v1370_v26  ;;  %v1540_v32 = vld [vmem:[#allocation8 + $0x64] sm:$0xf] }
  0x1e   :  { %484 = vmatpush.bf16.msra.mxu3 %v1877_v13  ;;  %v1372_v33 = vld [vmem:[#allocation8 + $0x6c] sm:$0xf0]  ;;  %v1883_v34 = vor.u32 %v1565_v29, %v1466_v28  ;;  %v1358_v35 = vld [vmem:[#allocation8 + $0x48] sm:$0xf]  ;;  %v1538_v36 = vld [vmem:[#allocation8 + $0x50] sm:$0xf0] }
  0x1f   :  { %v1454_v37 = vld [vmem:[#allocation9 + $0x48] sm:$0xf]  ;;  %v1562_v38 = vld [vmem:[#allocation9 + $0x50] sm:$0xf0]  ;;  %v1375_v39 = vor.u32 %v1540_v32, %v1372_v33  ;;  %v1346_v40 = vld [vmem:[#allocation8 + $0x30] sm:$0xf]  ;;  %v1359_v41 = vor.u32 %v1538_v36, %v1358_v35 }
  0x20   :  { %288 = vmatpush.bf16.msra.mxu1 %v1399_v21  ;;  %v1535_v42 = vld [vmem:[#allocation8 + $0x38] sm:$0xf0]  ;;  %v1537_v43 = vld [vmem:[#allocation8 + $0x4c] sm:$0xf]  ;;  %v1360_v44 = vld [vmem:[#allocation8 + $0x54] sm:$0xf0]  ;;  %v1886_v45 = vor.u32 %v1562_v38, %v1454_v37 }
  0x21   :  { %276 = vmatpush.bf16.msra.mxu0 %v1383_v22  ;;  %v100_v46 = vld [vmem:[#allocation6] sm:$0x1]  ;;  %v1414_v47 = vld [vmem:[#allocation8 + $0xb0] sm:$0xf]  ;;  %v1363_v52 = vor.u32 %v1537_v43, %v1360_v44  ;;  %v1534_v53 = vld [vmem:[#allocation8 + $0x34] sm:$0xf]  ;;  %v1347_v55 = vor.u32 %v1535_v42, %v1346_v40 }
  0x22   :  { %485 = vmatpush.bf16.msra.mxu3 %v1880_v25  ;;  %v1551_v48 = vld [vmem:[#allocation8 + $0xb8] sm:$0xf0]  ;;  %v1442_v49 = vld [vmem:[#allocation9 + $0x30] sm:$0xf]  ;;  %101 = vst [vmem:[#allocation2] sm:$0x1] %v100_v46 }
  0x23   :  { %v1559_v50 = vld [vmem:[#allocation9 + $0x38] sm:$0xf0]  ;;  %v1415_v51 = vor.u32 %v1551_v48, %v1414_v47  ;;  %v1348_v54 = vld [vmem:[#allocation8 + $0x3c] sm:$0xf0]  ;;  %v1402_v57 = vld [vmem:[#allocation8 + $0x98] sm:$0xf] }
  0x24   :  { %289 = vmatpush.bf16.msra.mxu1 %v1387_v30  ;;  %v102_v56 = vld [vmem:[#allocation3] sm:$0xf]  ;;  %v1548_v58 = vld [vmem:[#allocation8 + $0xa0] sm:$0xf0]  ;;  %v1889_v59 = vor.u32 %v1559_v50, %v1442_v49  ;;  %v1390_v1 = vld [vmem:[#allocation8 + $0x80] sm:$0xf]  ;;  %v1351_v3 = vor.u32 %v1534_v53, %v1348_v54 }
  0x25   :  { %277 = vmatpush.bf16.msra.mxu0 %v1371_v31  ;;  %300 = vmatpush.bf16.msra.mxu2 %v1415_v51  ;;  %v1334_v60 = vld [vmem:[#allocation8 + $0x18] sm:$0xf]  ;;  %v1532_v61 = vld [vmem:[#allocation8 + $0x20] sm:$0xf0]  ;;  %v1403_v63 = vor.u32 %v1548_v58, %v1402_v57  ;;  %v1545_v2 = vld [vmem:[#allocation8 + $0x88] sm:$0xf0]  ;;  %v103_v5 = vunpack.c.l.bf16 %v102_v56 }
  0x26   :  { %486 = vmatpush.bf16.msra.mxu3 %v1883_v34  ;;  %v1430_v62 = vld [vmem:[#allocation9 + $0x18] sm:$0xf]  ;;  %v1556_v0 = vld [vmem:[#allocation9 + $0x20] sm:$0xf0]  ;;  %v1322_v4 = vld [vmem:[#allocation8] sm:$0xf]  ;;  %v1335_v6 = vor.u32 %v1532_v61, %v1334_v60  ;;  %v1391_v11 = vor.u32 %v1545_v2, %v1390_v1 }
  0x27   :  { %v1529_v8 = vld [vmem:[#allocation8 + $0x8] sm:$0xf0]  ;;  %v1531_v9 = vld [vmem:[#allocation8 + $0x1c] sm:$0xf]  ;;  %v1336_v10 = vld [vmem:[#allocation8 + $0x24] sm:$0xf0]  ;;  %v1892_v12 = vor.u32 %v1556_v0, %v1430_v62 }
  0x28   :  { %290 = vmatpush.bf16.msra.mxu1 %v1375_v39  ;;  %v1418_v14 = vld [vmem:[#allocation9] sm:$0xf]  ;;  %v1378_v15 = vld [vmem:[#allocation8 + $0x68] sm:$0xf]  ;;  %v1542_v16 = vld [vmem:[#allocation8 + $0x70] sm:$0xf0]  ;;  %v1339_v20 = vor.u32 %v1531_v9, %v1336_v10  ;;  %v1323_v22 = vor.u32 %v1529_v8, %v1322_v4 }
  0x29   :  { %278 = vmatpush.bf16.msra.mxu0 %v1359_v41  ;;  %301 = vmatpush.bf16.msra.mxu2 %v1403_v63  ;;  %v1553_v17 = vld [vmem:[#allocation9 + $0x8] sm:$0xf0]  ;;  %v1504_v19 = vld [vmem:[#allocation9 + $0xb4] sm:$0xf0]  ;;  %v104_v21 = vmax.f32 %v103_v5, 0.0  ;;  %v1379_v27 = vor.u32 %v1542_v16, %v1378_v15  ;;  %s1308_s24 = sshll.u32 %s2258_s6, 4  ;;  %s1309_s24 = int_to_ptr.hbm [resolvable:$true] %s1308_s24 }
  0x2a   :  { %487 = vmatpush.bf16.msra.mxu3 %v1886_v45  ;;  %v1573_v18 = vld [vmem:[#allocation9 + $0xac] sm:$0xf]  ;;  %v1570_v23 = vld [vmem:[#allocation9 + $0x94] sm:$0xf]  ;;  %v1528_v24 = vld [vmem:[#allocation8 + $0x4] sm:$0xf]  ;;  %v1895_v28 = vor.u32 %v1553_v17, %v1418_v14 }
  0x2b   :  { %v1324_v26 = vld [vmem:[#allocation8 + $0xc] sm:$0xf0]  ;;  %v1897_v29 = vor.u32 %v1573_v18, %v1504_v19  ;;  %v1899_v30 = vld [vmem:[#allocation2] sm:$0x1]  ;;  %v1575_v32 = vld [vmem:[#allocation9 + $0xb8] sm:$0xf0]  ;;  %v1901_v38 = vpack.c.bf16 %v104_v21, %v104_v21 }
  0x2c   :  { %291 = vmatpush.bf16.msra.mxu1 %v1363_v52  ;;  %v1510_v31 = vld [vmem:[#allocation9 + $0xb0] sm:$0xf]  ;;  %v1492_v33 = vld [vmem:[#allocation9 + $0x9c] sm:$0xf0]  ;;  %v1539_v36 = vld [vmem:[#allocation8 + $0x58] sm:$0xf0]  ;;  %v1327_v37 = vor.u32 %v1528_v24, %v1324_v26  ;;  %v1905_v39 = vpack.c.bf16 %v1899_v30, %v1899_v30 }
  0x2d   :  { %279 = vmatpush.bf16.msra.mxu0 %v1347_v55  ;;  %302 = vmatpush.bf16.msra.mxu2 %v1391_v11  ;;  %v1366_v35 = vld [vmem:[#allocation8 + $0x50] sm:$0xf]  ;;  %v1907_v40 = vor.u32 %v1575_v32, %v1510_v31  ;;  %v1911_v41 = vor.u32 %v1570_v23, %v1492_v33  ;;  %v1567_v42 = vld [vmem:[#allocation9 + $0x7c] sm:$0xf]  ;;  %v1498_v43 = vld [vmem:[#allocation9 + $0x98] sm:$0xf] }
  0x2e   :  { %488 = vmatpush.bf16.msra.mxu3 %v1889_v59  ;;  %v1572_v44 = vld [vmem:[#allocation9 + $0xa0] sm:$0xf0]  ;;  %v1367_v46 = vor.u32 %v1539_v36, %v1366_v35  ;;  %v1480_v47 = vld [vmem:[#allocation9 + $0x84] sm:$0xf0]  ;;  %v1354_v48 = vld [vmem:[#allocation8 + $0x38] sm:$0xf] }
  0x2f   :  { %v1536_v49 = vld [vmem:[#allocation8 + $0x40] sm:$0xf0]  ;;  %v1917_v50 = vor.u32 %v1572_v44, %v1498_v43  ;;  %v1920_v51 = vor.u32 %v1567_v42, %v1480_v47  ;;  %v1486_v53 = vld [vmem:[#allocation9 + $0x80] sm:$0xf]  ;;  %v1569_v54 = vld [vmem:[#allocation9 + $0x88] sm:$0xf0] }
  0x30   :  { %292 = vmatpush.bf16.msra.mxu1 %v1351_v3  ;;  %v1564_v52 = vld [vmem:[#allocation9 + $0x64] sm:$0xf]  ;;  %v1355_v55 = vor.u32 %v1536_v49, %v1354_v48  ;;  %v1468_v56 = vld [vmem:[#allocation9 + $0x6c] sm:$0xf0]  ;;  %v1342_v57 = vld [vmem:[#allocation8 + $0x20] sm:$0xf]  ;;  %v1925_v60 = vor.u32 %v1569_v54, %v1486_v53 }
  0x31   :  { %280 = vmatpush.bf16.msra.mxu0 %v1335_v6  ;;  %303 = vmatpush.bf16.msra.mxu2 %v1379_v27  ;;  %v1533_v58 = vld [vmem:[#allocation8 + $0x28] sm:$0xf0]  ;;  %v1928_v61 = vor.u32 %v1564_v52, %v1468_v56  ;;  %v1474_v63 = vld [vmem:[#allocation9 + $0x68] sm:$0xf]  ;;  %v1566_v0 = vld [vmem:[#allocation9 + $0x70] sm:$0xf0] }
  0x32   :  { %489 = vmatpush.bf16.msra.mxu3 %v1892_v12  ;;  %v1561_v62 = vld [vmem:[#allocation9 + $0x4c] sm:$0xf]  ;;  %v1343_v1 = vor.u32 %v1533_v58, %v1342_v57  ;;  %v1456_v2 = vld [vmem:[#allocation9 + $0x54] sm:$0xf0]  ;;  %v1330_v3 = vld [vmem:[#allocation8 + $0x8] sm:$0xf]  ;;  %v1932_v5 = vor.u32 %v1566_v0, %v1474_v63 }
  0x33   :  { %v1530_v4 = vld [vmem:[#allocation8 + $0x10] sm:$0xf0]  ;;  %v1935_v6 = vor.u32 %v1561_v62, %v1456_v2  ;;  %v1462_v8 = vld [vmem:[#allocation9 + $0x50] sm:$0xf]  ;;  %v1563_v9 = vld [vmem:[#allocation9 + $0x58] sm:$0xf0] }
  0x34   :  { %293 = vmatpush.bf16.msra.mxu1 %v1339_v20  ;;  %v1331_v10 = vor.u32 %v1530_v4, %v1330_v3  ;;  %v1558_v11 = vld [vmem:[#allocation9 + $0x34] sm:$0xf]  ;;  %v1444_v14 = vld [vmem:[#allocation9 + $0x3c] sm:$0xf0]  ;;  %v1939_v15 = vor.u32 %v1563_v9, %v1462_v8  ;;  %v1450_v17 = vld [vmem:[#allocation9 + $0x38] sm:$0xf] }
  0x35   :  { %281 = vmatpush.bf16.msra.mxu0 %v1323_v22  ;;  %304 = vmatpush.bf16.msra.mxu2 %v1367_v46  ;;  %v1942_v16 = vor.u32 %v1558_v11, %v1444_v14  ;;  %v1560_v18 = vld [vmem:[#allocation9 + $0x40] sm:$0xf0]  ;;  %v1555_v19 = vld [vmem:[#allocation9 + $0x1c] sm:$0xf]  ;;  %v1432_v20 = vld [vmem:[#allocation9 + $0x24] sm:$0xf0] }
  0x36   :  { %490 = vmatpush.bf16.msra.mxu3 %v1895_v28  ;;  %v1947_v21 = vor.u32 %v1560_v18, %v1450_v17  ;;  %v1951_v22 = vor.u32 %v1555_v19, %v1432_v20  ;;  %v1438_v23 = vld [vmem:[#allocation9 + $0x20] sm:$0xf]  ;;  %v1557_v24 = vld [vmem:[#allocation9 + $0x28] sm:$0xf0]  ;;  %v1552_v26 = vld [vmem:[#allocation9 + $0x4] sm:$0xf] }
  0x37   :  { %v1420_v27 = vld [vmem:[#allocation9 + $0xc] sm:$0xf0]  ;;  %v1956_v31 = vor.u32 %v1557_v24, %v1438_v23  ;;  %v1426_v33 = vld [vmem:[#allocation9 + $0x8] sm:$0xf]  ;;  %v1554_v35 = vld [vmem:[#allocation9 + $0x10] sm:$0xf0] }
  0x38   :  { %294 = vmatpush.bf16.msra.mxu1 %v1327_v37  ;;  %282 = vmatmul.bf16.vlgmr.msra.gmra.mxu0 %v1901_v38  ;;  %v1959_v32 = vor.u32 %v1552_v26, %v1420_v27  ;;  %v1964_v36 = vor.u32 %v1554_v35, %v1426_v33  ;;  %v138_v37 = vld [vmem:[%s2256_s4] sm:$0x7]  ;;  %s1823_s4 = smov [#allocation12]  }
  0x39   :  { %496 = vmatpush.bf16.msrb.mxu0 %v1897_v29  ;;  %491 = vmatmul.bf16.vlgmr.msra.gmra.mxu3 %v1905_v39  ;;  %v140_v42 = vperm.slane %v138_v37, 0  ;;  %v141_v62 = vperm.slane %v138_v37, 1  ;;  %s1306_s21 = sshll.u32 %s1823_s4, 4  ;;  %s1307_s21 = int_to_ptr.vmem [resolvable:$true] %s1306_s21 }
  0x3a   :  { %583 = vmatpush.bf16.msrb.mxu3 %v1897_v29  ;;  %305 = vmatpush.bf16.msra.mxu2 %v1355_v55 }
  0x3b   :  { %295 = vmatmul.bf16.vlgmr.msra.gmra.mxu1 %v1901_v38 }
  0x3c   :  { %509 = vmatpush.bf16.msrb.mxu1 %v1907_v40 }
  0x3d   :  { %497 = vmatpush.bf16.msrb.mxu0 %v1911_v41 }
  0x3e   :  { %584 = vmatpush.bf16.msrb.mxu3 %v1911_v41  ;;  %306 = vmatpush.bf16.msra.mxu2 %v1343_v1 }
  0x40   :  { %510 = vmatpush.bf16.msrb.mxu1 %v1917_v50 }
  0x41   :  { %498 = vmatpush.bf16.msrb.mxu0 %v1920_v51 }
  0x42   :  { %585 = vmatpush.bf16.msrb.mxu3 %v1920_v51  ;;  %307 = vmatpush.bf16.msra.mxu2 %v1331_v10 }
  0x44   :  { %511 = vmatpush.bf16.msrb.mxu1 %v1925_v60 }
  0x45   :  { %499 = vmatpush.bf16.msrb.mxu0 %v1928_v61  ;;  %308 = vmatmul.bf16.vlgmr.msra.gmra.mxu2 %v1901_v38 }
  0x46   :  { %586 = vmatpush.bf16.msrb.mxu3 %v1928_v61  ;;  %570 = vmatpush.bf16.msrb.mxu2 %v1874_v7 }
  0x48   :  { %512 = vmatpush.bf16.msrb.mxu1 %v1932_v5 }
  0x49   :  { %500 = vmatpush.bf16.msrb.mxu0 %v1935_v6 }
  0x4a   :  { %587 = vmatpush.bf16.msrb.mxu3 %v1935_v6  ;;  %571 = vmatpush.bf16.msrb.mxu2 %v1877_v13 }
  0x4c   :  { %513 = vmatpush.bf16.msrb.mxu1 %v1939_v15 }
  0x4d   :  { %501 = vmatpush.bf16.msrb.mxu0 %v1942_v16 }
  0x4e   :  { %588 = vmatpush.bf16.msrb.mxu3 %v1942_v16  ;;  %572 = vmatpush.bf16.msrb.mxu2 %v1880_v25 }
  0x50   :  { %514 = vmatpush.bf16.msrb.mxu1 %v1947_v21 }
  0x51   :  { %502 = vmatpush.bf16.msrb.mxu0 %v1951_v22 }
  0x52   :  { %589 = vmatpush.bf16.msrb.mxu3 %v1951_v22  ;;  %573 = vmatpush.bf16.msrb.mxu2 %v1883_v34 }
  0x54   :  { %515 = vmatpush.bf16.msrb.mxu1 %v1956_v31 }
  0x55   :  { %503 = vmatpush.bf16.msrb.mxu0 %v1959_v32 }
  0x56   :  { %590 = vmatpush.bf16.msrb.mxu3 %v1959_v32  ;;  %574 = vmatpush.bf16.msrb.mxu2 %v1886_v45 }
  0x58   :  { %504 = vmatmul.bf16.vlgmr.msrb.gmra.mxu0 %v1905_v39  ;;  %516 = vmatpush.bf16.msrb.mxu1 %v1964_v36 }
  0x59   :  { %596 = vmatpush.bf16.msra.mxu0 %v1907_v40 }
  0x5a   :  { %699 = vmatpush.bf16.msra.mxu3 %v1907_v40  ;;  %575 = vmatpush.bf16.msrb.mxu2 %v1889_v59 }
  0x5b   :  { %517 = vmatmul.bf16.vlgmr.msrb.gmra.mxu1 %v1905_v39  ;;  %v345_v39 = vld [vmem:[#allocation11] sm:$0x7] }
  0x5c   :  { %673 = vmatpush.bf16.msra.mxu1 %v1874_v7  ;;  %v2027_v44 = vperm.slane %v345_v39, 0  ;;  %v2033_v63 = vperm.slane %v345_v39, 1  ;;  %v2039_v24 = vperm.slane %v345_v39, 2 }
  0x5d   :  { %597 = vmatpush.bf16.msra.mxu0 %v1917_v50 }
  0x5e   :  { %700 = vmatpush.bf16.msra.mxu3 %v1917_v50  ;;  %576 = vmatpush.bf16.msrb.mxu2 %v1892_v12 }
  0x60   :  { %674 = vmatpush.bf16.msra.mxu1 %v1877_v13 }
  0x61   :  { %598 = vmatpush.bf16.msra.mxu0 %v1925_v60 }
  0x62   :  { %701 = vmatpush.bf16.msra.mxu3 %v1925_v60  ;;  %577 = vmatpush.bf16.msrb.mxu2 %v1895_v28 }
  0x64   :  { %675 = vmatpush.bf16.msra.mxu1 %v1880_v25 }
  0x65   :  { %599 = vmatpush.bf16.msra.mxu0 %v1932_v5 }
  0x66   :  { %702 = vmatpush.bf16.msra.mxu3 %v1932_v5  ;;  %686 = vmatpush.bf16.msra.mxu2 %v1897_v29 }
  0x68   :  { %676 = vmatpush.bf16.msra.mxu1 %v1883_v34 }
  0x69   :  { %600 = vmatpush.bf16.msra.mxu0 %v1939_v15 }
  0x6a   :  { %703 = vmatpush.bf16.msra.mxu3 %v1939_v15  ;;  %687 = vmatpush.bf16.msra.mxu2 %v1911_v41 }
  0x6c   :  { %677 = vmatpush.bf16.msra.mxu1 %v1886_v45 }
  0x6d   :  { %601 = vmatpush.bf16.msra.mxu0 %v1947_v21 }
  0x6e   :  { %704 = vmatpush.bf16.msra.mxu3 %v1947_v21  ;;  %688 = vmatpush.bf16.msra.mxu2 %v1920_v51 }
  0x70   :  { %678 = vmatpush.bf16.msra.mxu1 %v1889_v59 }
  0x71   :  { %602 = vmatpush.bf16.msra.mxu0 %v1956_v31 }
  0x72   :  { %705 = vmatpush.bf16.msra.mxu3 %v1956_v31  ;;  %689 = vmatpush.bf16.msra.mxu2 %v1928_v61 }
  0x74   :  { %679 = vmatpush.bf16.msra.mxu1 %v1892_v12 }
  0x75   :  { %603 = vmatpush.bf16.msra.mxu0 %v1964_v36 }
  0x76   :  { %706 = vmatpush.bf16.msra.mxu3 %v1964_v36  ;;  %690 = vmatpush.bf16.msra.mxu2 %v1935_v6 }
  0x78   :  { %680 = vmatpush.bf16.msra.mxu1 %v1895_v28 }
  0x79   :  { %775 = vmatpush.bf16.msrb.mxu0 %v1874_v7 }
  0x7a   :  { %691 = vmatpush.bf16.msra.mxu2 %v1942_v16 }
  0x7c   :  { %788 = vmatpush.bf16.msrb.mxu1 %v1897_v29 }
  0x7d   :  { %776 = vmatpush.bf16.msrb.mxu0 %v1877_v13 }
  0x7e   :  { %692 = vmatpush.bf16.msra.mxu2 %v1951_v22 }
  0x80   :  { %789 = vmatpush.bf16.msrb.mxu1 %v1911_v41 }
  0x81   :  { %777 = vmatpush.bf16.msrb.mxu0 %v1880_v25 }
  0x82   :  { %693 = vmatpush.bf16.msra.mxu2 %v1959_v32 }
  0x84   :  { %790 = vmatpush.bf16.msrb.mxu1 %v1920_v51 }
  0x85   :  { %778 = vmatpush.bf16.msrb.mxu0 %v1883_v34 }
  0x88   :  { %791 = vmatpush.bf16.msrb.mxu1 %v1928_v61 }
  0x89   :  { %779 = vmatpush.bf16.msrb.mxu0 %v1886_v45 }
  0x8c   :  { %792 = vmatpush.bf16.msrb.mxu1 %v1935_v6 }
  0x8d   :  { %780 = vmatpush.bf16.msrb.mxu0 %v1889_v59 }
  0x90   :  { %793 = vmatpush.bf16.msrb.mxu1 %v1942_v16 }
  0x91   :  { %781 = vmatpush.bf16.msrb.mxu0 %v1892_v12 }
  0x94   :  { %794 = vmatpush.bf16.msrb.mxu1 %v1951_v22 }
  0x95   :  { %782 = vmatpush.bf16.msrb.mxu0 %v1895_v28 }
  0x98   :  { %795 = vmatpush.bf16.msrb.mxu1 %v1959_v32 }
  0xb5   :  { %v283_v38 = vpop.f32.mrf.mxu0 }
  0xb6   :  { %v2029_v46 = vadd.f32 %v283_v38, %v140_v42 }
  0xb8   :  { %v296_v43 = vpop.f32.mrf.mxu1 }
  0xb9   :  { %v2035_v0 = vadd.f32 %v296_v43, %v141_v62  ;;  %v142_v43 = vperm.slane %v138_v37, 2 }
  0xbc   :  { %v492_v47 = vpop.f32.mrf.mxu3 }
  0xbd   :  { %v493_v48 = vadd.f32 %v492_v47, %v2027_v44  ;;  %v285_v49 = vpop.f32.mrf.mxu0 }
  0xbf   :  { %v522_v52 = vadd.f32 %v493_v48, %v2029_v46 }
  0xc0   :  { %v298_v53 = vpop.f32.mrf.mxu1 }
  0xc1   :  { %v1512_v54 = vmul.f32 -1.442695, %v522_v52 }
  0xc3   :  { %1584 = vpow2.f32 %v1512_v54 }
  0xc4   :  { %v494_v55 = vpop.f32.mrf.mxu3 }
  0xc8   :  { %v309_v58 = vpop.f32.mrf.mxu2 }
  0xc9   :  { %v1585_v56 = vpop.eup %1584  ;;  %v2042_v49 = vadd.f32 %v309_v58, %v142_v43 }
  0xca   :  { %v526_v57 = vadd.f32 1.0, %v1585_v56 }
  0xcc   :  { %1586 = vrcp.f32 %v526_v57  ;;  %vm532_vm0 = vweird.f32 %v526_v57  ;;  %v538_v20 = vand.u32 2147483648, %v526_v57  ;;  %v536_v26 = vand.u32 2147483647, %v526_v57 }
  0xce   :  { %v539_v38 = vor.u32 1.1754944e-38, %v538_v20  ;;  %vm537_vm3 = vcmp.eq.f32.partialorder %v536_v26, 8.507059e+37 }
  0xd0   :  { %v311_v8 = vpop.f32.mrf.mxu2 }
  0xd2   :  { %v1587_v1 = vpop.eup %1586 }
  0xd3   :  { %v528_v4 = vmul.f32 %v1587_v1, %v526_v57  ;;  %vm533_vm1 = vweird.f32 %v1587_v1 }
  0xd4   :  { %vm534_vm2 = vmor %vm532_vm0, %vm533_vm1 }
  0xd5   :  { %v505_v2 = vpop.f32.mrf.mxu0  ;;  %v529_v11 = vsub.f32 1.0, %v528_v4 }
  0xd6   :  { %v506_v3 = vadd.f32 %v505_v2, %v2033_v63 }
  0xd7   :  { %v530_v17 = vmul.f32 %v1587_v1, %v529_v11 }
  0xd8   :  { %v542_v9 = vadd.f32 %v506_v3, %v2035_v0  ;;  %v518_v10 = vpop.f32.mrf.mxu1 }
  0xd9   :  { %v531_v19 = vadd.f32 %v1587_v1, %v530_v17  ;;  %v519_v42 = vadd.f32 %v518_v10, %v2039_v24 }
  0xda   :  { %v1513_v14 = vmul.f32 -1.442695, %v542_v9 }
  0xdb   :  { %v535_v35 = vsel %vm534_vm2, %v1587_v1, %v531_v19 }
  0xdc   :  { %1588 = vpow2.f32 %v1513_v14  ;;  %v540_v47 = vsel %vm537_vm3, %v539_v38, %v535_v35 }
  0xdd   :  { %v507_v18 = vpop.f32.mrf.mxu0  ;;  %v562_v48 = vmul.f32 %v540_v47, %v519_v42 }
  0xdf   :  { %v563_v39 = vadd.f32 %v562_v48, %v2042_v49 }
  0xe0   :  { %v520_v23 = vpop.f32.mrf.mxu1 }
  0xe2   :  { %v1589_v27 = vpop.eup %1588 }
  0xe3   :  { %v546_v33 = vadd.f32 1.0, %v1589_v27 }
  0xe5   :  { %1590 = vrcp.f32 %v546_v33  ;;  %v558_v55 = vand.u32 2147483648, %v546_v33  ;;  %v556_v57 = vand.u32 2147483647, %v546_v33  ;;  %vm552_vm5 = vweird.f32 %v546_v33 }
  0xe6   :  { %1592 = vtanh.f32 %v563_v39 }
  0xe7   :  { %v559_v1 = vor.u32 1.1754944e-38, %v558_v55  ;;  %vm557_vm7 = vcmp.eq.f32.partialorder %v556_v57, 8.507059e+37 }
  0xeb   :  { %v1591_v52 = vpop.eup %1590 }
  0xec   :  { %v548_v53 = vmul.f32 %v1591_v52, %v546_v33  ;;  %vm553_vm4 = vweird.f32 %v1591_v52  ;;  %v1593_v58 = vpop.eup %1592 }
  0xed   :  { %vm554_vm6 = vmor %vm552_vm5, %vm553_vm4 }
  0xee   :  { %v549_v54 = vsub.f32 1.0, %v548_v53 }
  0xf0   :  { %v550_v56 = vmul.f32 %v1591_v52, %v549_v54 }
  0xf2   :  { %v551_v62 = vadd.f32 %v1591_v52, %v550_v56 }
  0xf4   :  { %v555_v2 = vsel %vm554_vm6, %v1591_v52, %v551_v62 }
  0xf5   :  { %v560_v37 = vsel %vm557_vm7, %v559_v1, %v555_v2 }
  0xf6   :  { %v565_v3 = vsub.f32 1.0, %v560_v37  ;;  %v567_v8 = vmul.f32 %v560_v37, %v1899_v30 }
  0xf8   :  { %v566_v4 = vmul.f32 %v1593_v58, %v565_v3 }
  0xfa   :  { %v2046_v9 = vadd.f32 %v567_v8, %v566_v4 }
  0xfc   :  { %v569_v10 = vpack.c.bf16 %v2046_v9, %v2046_v9 }
  0xfe   :  { %578 = vmatmul.bf16.vlgmr.msrb.gmra.mxu2 %v569_v10  ;;  %591 = vmatmul.bf16.vlgmr.msrb.gmra.mxu3 %v569_v10 }
  0xff   :  { %604 = vmatmul.bf16.vlgmr.msra.gmra.mxu0 %v569_v10  ;;  %801 = vmatpush.bf16.msrb.mxu2 %v1907_v40 }
 0x100   :  { %879 = vmatpush.bf16.msrb.mxu3 %v1874_v7  ;;  %892 = vmatpush.bf16.msra.mxu0 %v1897_v29 }
 0x103   :  { %802 = vmatpush.bf16.msrb.mxu2 %v1917_v50 }
 0x104   :  { %880 = vmatpush.bf16.msrb.mxu3 %v1877_v13  ;;  %893 = vmatpush.bf16.msra.mxu0 %v1911_v41 }
 0x107   :  { %803 = vmatpush.bf16.msrb.mxu2 %v1925_v60 }
 0x108   :  { %881 = vmatpush.bf16.msrb.mxu3 %v1880_v25  ;;  %894 = vmatpush.bf16.msra.mxu0 %v1920_v51 }
 0x10b   :  { %804 = vmatpush.bf16.msrb.mxu2 %v1932_v5 }
 0x10c   :  { %882 = vmatpush.bf16.msrb.mxu3 %v1883_v34  ;;  %895 = vmatpush.bf16.msra.mxu0 %v1928_v61 }
 0x10f   :  { %805 = vmatpush.bf16.msrb.mxu2 %v1939_v15 }
 0x110   :  { %883 = vmatpush.bf16.msrb.mxu3 %v1886_v45  ;;  %896 = vmatpush.bf16.msra.mxu0 %v1935_v6 }
 0x113   :  { %806 = vmatpush.bf16.msrb.mxu2 %v1947_v21 }
 0x114   :  { %884 = vmatpush.bf16.msrb.mxu3 %v1889_v59  ;;  %897 = vmatpush.bf16.msra.mxu0 %v1942_v16 }
 0x117   :  { %807 = vmatpush.bf16.msrb.mxu2 %v1956_v31 }
 0x118   :  { %885 = vmatpush.bf16.msrb.mxu3 %v1892_v12  ;;  %898 = vmatpush.bf16.msra.mxu0 %v1951_v22 }
 0x11b   :  { %808 = vmatpush.bf16.msrb.mxu2 %v1964_v36 }
 0x11c   :  { %886 = vmatpush.bf16.msrb.mxu3 %v1895_v28  ;;  %899 = vmatpush.bf16.msra.mxu0 %v1959_v32 }
 0x17c   :  { %v605_v30 = vpop.f32.mrf.mxu0 }
 0x17d   :  { %v606_v1 = vadd.f32 %v605_v30, %v2039_v24 }
 0x17f   :  { %v656_v8 = vrot.slane %v606_v1, 7 }
 0x181   :  { %v579_v11 = vpop.f32.mrf.mxu2  ;;  %v592_v14 = vpop.f32.mrf.mxu3 }
 0x182   :  { %v580_v17 = vadd.f32 %v579_v11, %v2027_v44  ;;  %v593_v18 = vadd.f32 %v592_v14, %v2033_v63 }
 0x184   :  { %v610_v19 = vrot.slane %v580_v17, 7  ;;  %v633_v20 = vrot.slane %v593_v18, 7  ;;  %v607_v23 = vpop.f32.mrf.mxu0 }
 0x186   :  { %v612_v26 = vadd.f32 %v610_v19, %v2029_v46  ;;  %v635_v27 = vadd.f32 %v633_v20, %v2035_v0 }
 0x188   :  { %v1514_v33 = vmul.f32 -1.442695, %v612_v26  ;;  %v1515_v35 = vmul.f32 -1.442695, %v635_v27  ;;  %v664_v27 = vrot.slane %v2046_v9, 7 }
 0x189   :  { %v581_v38 = vpop.f32.mrf.mxu2  ;;  %v594_v42 = vpop.f32.mrf.mxu3 }
 0x18a   :  { %1594 = vpow2.f32 %v1514_v33 }
 0x18b   :  { %1596 = vpow2.f32 %v1515_v35 }
 0x190   :  { %v1595_v43 = vpop.eup %1594 }
 0x191   :  { %v1597_v47 = vpop.eup %1596  ;;  %v616_v48 = vadd.f32 1.0, %v1595_v43 }
 0x192   :  { %v639_v52 = vadd.f32 1.0, %v1597_v47 }
 0x193   :  { %1598 = vrcp.f32 %v616_v48  ;;  %v628_v57 = vand.u32 2147483648, %v616_v48  ;;  %v626_v37 = vand.u32 2147483647, %v616_v48  ;;  %vm622_vm9 = vweird.f32 %v616_v48 }
 0x194   :  { %1600 = vrcp.f32 %v639_v52  ;;  %v651_v18 = vand.u32 2147483648, %v639_v52  ;;  %vm645_vm13 = vweird.f32 %v639_v52  ;;  %v649_v19 = vand.u32 2147483647, %v639_v52 }
 0x195   :  { %v629_v4 = vor.u32 1.1754944e-38, %v628_v57  ;;  %vm627_vm11 = vcmp.eq.f32.partialorder %v626_v37, 8.507059e+37 }
 0x196   :  { %v652_v23 = vor.u32 1.1754944e-38, %v651_v18  ;;  %vm650_vm15 = vcmp.eq.f32.partialorder %v649_v19, 8.507059e+37 }
 0x199   :  { %v1599_v53 = vpop.eup %1598 }
 0x19a   :  { %v1601_v39 = vpop.eup %1600  ;;  %v618_v54 = vmul.f32 %v1599_v53, %v616_v48  ;;  %vm623_vm8 = vweird.f32 %v1599_v53 }
 0x19b   :  { %v641_v55 = vmul.f32 %v1601_v39, %v639_v52  ;;  %vm624_vm10 = vmor %vm622_vm9, %vm623_vm8  ;;  %vm646_vm12 = vweird.f32 %v1601_v39  ;;  %vm1286_vm8 = vcmask 1040384   ;;  %vm1288_vm9 = vcmask 1041408  }
 0x19c   :  { %v619_v56 = vsub.f32 1.0, %v618_v54  ;;  %vm647_vm14 = vmor %vm645_vm13, %vm646_vm12 }
 0x19d   :  { %v642_v62 = vsub.f32 1.0, %v641_v55 }
 0x19e   :  { %v620_v2 = vmul.f32 %v1599_v53, %v619_v56 }
 0x19f   :  { %v643_v3 = vmul.f32 %v1601_v39, %v642_v62 }
 0x1a0   :  { %v621_v58 = vadd.f32 %v1599_v53, %v620_v2 }
 0x1a1   :  { %v644_v14 = vadd.f32 %v1601_v39, %v643_v3 }
 0x1a2   :  { %v625_v10 = vsel %vm624_vm10, %v1599_v53, %v621_v58 }
 0x1a3   :  { %v630_v11 = vsel %vm627_vm11, %v629_v4, %v625_v10  ;;  %v648_v20 = vsel %vm647_vm14, %v1601_v39, %v644_v14 }
 0x1a4   :  { %v658_v17 = vmul.f32 %v656_v8, %v630_v11  ;;  %v653_v26 = vsel %vm650_vm15, %v652_v23, %v648_v20 }
 0x1a5   :  { %v661_v33 = vsub.f32 1.0, %v653_v26  ;;  %v666_v42 = vmul.f32 %v664_v27, %v653_v26 }
 0x1a6   :  { %v659_v30 = vadd.f32 %v658_v17, %v2042_v49 }
 0x1a8   :  { %1602 = vtanh.f32 %v659_v30 }
 0x1ae   :  { %v1603_v35 = vpop.eup %1602 }
 0x1af   :  { %v662_v38 = vmul.f32 %v1603_v35, %v661_v33 }
 0x1b1   :  { %v2081_v43 = vadd.f32 %v666_v42, %v662_v38 }
 0x1b3   :  { %v668_v47 = vpack.c.bf16 %v2081_v43, %v2081_v43 }
 0x1b5   :  { %v670_v48 = vshrl.u32 %v668_v47, 16 }
 0x1b7   :  { %681 = vmatmul.bf16.vlgmr.msra.gmra.mxu1 %v670_v48  ;;  %694 = vmatmul.bf16.vlgmr.msra.gmra.mxu2 %v670_v48 }
 0x1b8   :  { %707 = vmatmul.bf16.vlgmr.msra.gmra.mxu3 %v670_v48  ;;  %905 = vmatpush.bf16.msra.mxu1 %v1907_v40 }
 0x1b9   :  { %981 = vmatpush.bf16.msra.mxu2 %v1874_v7  ;;  %994 = vmatpush.bf16.msra.mxu3 %v1897_v29 }
 0x1bc   :  { %906 = vmatpush.bf16.msra.mxu1 %v1917_v50 }
 0x1bd   :  { %982 = vmatpush.bf16.msra.mxu2 %v1877_v13  ;;  %995 = vmatpush.bf16.msra.mxu3 %v1911_v41 }
 0x1c0   :  { %907 = vmatpush.bf16.msra.mxu1 %v1925_v60 }
 0x1c1   :  { %983 = vmatpush.bf16.msra.mxu2 %v1880_v25  ;;  %996 = vmatpush.bf16.msra.mxu3 %v1920_v51 }
 0x1c4   :  { %908 = vmatpush.bf16.msra.mxu1 %v1932_v5 }
 0x1c5   :  { %984 = vmatpush.bf16.msra.mxu2 %v1883_v34  ;;  %997 = vmatpush.bf16.msra.mxu3 %v1928_v61 }
 0x1c8   :  { %909 = vmatpush.bf16.msra.mxu1 %v1939_v15 }
 0x1c9   :  { %985 = vmatpush.bf16.msra.mxu2 %v1886_v45  ;;  %998 = vmatpush.bf16.msra.mxu3 %v1935_v6 }
 0x1cc   :  { %910 = vmatpush.bf16.msra.mxu1 %v1947_v21 }
 0x1cd   :  { %986 = vmatpush.bf16.msra.mxu2 %v1889_v59  ;;  %999 = vmatpush.bf16.msra.mxu3 %v1942_v16 }
 0x1d0   :  { %911 = vmatpush.bf16.msra.mxu1 %v1956_v31 }
 0x1d1   :  { %987 = vmatpush.bf16.msra.mxu2 %v1892_v12  ;;  %1000 = vmatpush.bf16.msra.mxu3 %v1951_v22 }
 0x1d4   :  { %912 = vmatpush.bf16.msra.mxu1 %v1964_v36 }
 0x1d5   :  { %988 = vmatpush.bf16.msra.mxu2 %v1895_v28  ;;  %1001 = vmatpush.bf16.msra.mxu3 %v1959_v32 }
 0x234   :  { %v682_v52 = vpop.f32.mrf.mxu1 }
 0x235   :  { %v683_v53 = vadd.f32 %v682_v52, %v2027_v44 }
 0x237   :  { %v713_v39 = vrot.slane %v683_v53, 6 }
 0x239   :  { %v715_v54 = vadd.f32 %v713_v39, %v2029_v46 }
 0x23a   :  { %v695_v55 = vpop.f32.mrf.mxu2 }
 0x23b   :  { %v1516_v56 = vmul.f32 -1.442695, %v715_v54  ;;  %v696_v57 = vadd.f32 %v695_v55, %v2033_v63  ;;  %v708_v62 = vpop.f32.mrf.mxu3 }
 0x23c   :  { %v684_v1 = vpop.f32.mrf.mxu1  ;;  %v709_v20 = vadd.f32 %v708_v62, %v2039_v24 }
 0x23d   :  { %1604 = vpow2.f32 %v1516_v56  ;;  %v736_v2 = vrot.slane %v696_v57, 6 }
 0x23e   :  { %v759_v48 = vrot.slane %v709_v20, 6 }
 0x23f   :  { %v738_v37 = vadd.f32 %v736_v2, %v2035_v0 }
 0x241   :  { %v1517_v3 = vmul.f32 -1.442695, %v738_v37 }
 0x242   :  { %v697_v58 = vpop.f32.mrf.mxu2 }
 0x243   :  { %v1605_v4 = vpop.eup %1604  ;;  %1606 = vpow2.f32 %v1517_v3  ;;  %v710_v8 = vpop.f32.mrf.mxu3  ;;  %v767_v3 = vrot.slane %v2081_v43, 7 }
 0x244   :  { %v719_v10 = vadd.f32 1.0, %v1605_v4 }
 0x246   :  { %1608 = vrcp.f32 %v719_v10  ;;  %v731_v30 = vand.u32 2147483648, %v719_v10  ;;  %v729_v26 = vand.u32 2147483647, %v719_v10  ;;  %vm725_vm1 = vweird.f32 %v719_v10 }
 0x248   :  { %v732_v38 = vor.u32 1.1754944e-38, %v731_v30  ;;  %vm730_vm3 = vcmp.eq.f32.partialorder %v729_v26, 8.507059e+37 }
 0x249   :  { %v1607_v11 = vpop.eup %1606 }
 0x24a   :  { %v742_v14 = vadd.f32 1.0, %v1607_v11  ;;  %v1287_v11 = vsel %vm1286_vm8, %v2046_v9, %v2081_v43 }
 0x24c   :  { %v1609_v17 = vpop.eup %1608  ;;  %1610 = vrcp.f32 %v742_v14  ;;  %v754_v39 = vand.u32 2147483648, %v742_v14  ;;  %v752_v55 = vand.u32 2147483647, %v742_v14  ;;  %vm748_vm5 = vweird.f32 %v742_v14 }
 0x24d   :  { %v721_v18 = vmul.f32 %v1609_v17, %v719_v10  ;;  %vm726_vm0 = vweird.f32 %v1609_v17 }
 0x24e   :  { %vm727_vm2 = vmor %vm725_vm1, %vm726_vm0  ;;  %v755_v62 = vor.u32 1.1754944e-38, %v754_v39  ;;  %vm753_vm7 = vcmp.eq.f32.partialorder %v752_v55, 8.507059e+37 }
 0x24f   :  { %v722_v19 = vsub.f32 1.0, %v721_v18 }
 0x251   :  { %v723_v23 = vmul.f32 %v1609_v17, %v722_v19 }
 0x252   :  { %v1611_v27 = vpop.eup %1610 }
 0x253   :  { %v744_v33 = vmul.f32 %v1611_v27, %v742_v14  ;;  %v724_v35 = vadd.f32 %v1609_v17, %v723_v23  ;;  %vm749_vm4 = vweird.f32 %v1611_v27 }
 0x254   :  { %vm750_vm6 = vmor %vm748_vm5, %vm749_vm4 }
 0x255   :  { %v745_v42 = vsub.f32 1.0, %v744_v33  ;;  %v728_v47 = vsel %vm727_vm2, %v1609_v17, %v724_v35  ;;  %vm1290_vm2 = vcmask 1042432  }
 0x256   :  { %v733_v52 = vsel %vm730_vm3, %v732_v38, %v728_v47 }
 0x257   :  { %v746_v53 = vmul.f32 %v1611_v27, %v745_v42  ;;  %v761_v54 = vmul.f32 %v759_v48, %v733_v52 }
 0x259   :  { %v747_v56 = vadd.f32 %v1611_v27, %v746_v53  ;;  %v762_v57 = vadd.f32 %v761_v54, %v2042_v49 }
 0x25b   :  { %v751_v1 = vsel %vm750_vm6, %v1611_v27, %v747_v56  ;;  %1612 = vtanh.f32 %v762_v57 }
 0x25c   :  { %v756_v2 = vsel %vm753_vm7, %v755_v62, %v751_v1 }
 0x25d   :  { %v764_v37 = vsub.f32 1.0, %v756_v2  ;;  %v769_v8 = vmul.f32 %v767_v3, %v756_v2 }
 0x261   :  { %v1613_v58 = vpop.eup %1612 }
 0x262   :  { %v765_v4 = vmul.f32 %v1613_v58, %v764_v37 }
 0x264   :  { %v2116_v10 = vadd.f32 %v769_v8, %v765_v4 }
 0x266   :  { %v771_v14 = vpack.c.bf16 %v2116_v10, %v2116_v10  ;;  %v2123_v17 = vsel %vm1288_vm9, %v1287_v11, %v2116_v10 }
 0x268   :  { %v773_v18 = vrot.slane %v771_v14, 1 }
 0x26a   :  { %783 = vmatmul.bf16.vlgmr.msrb.gmra.mxu0 %v773_v18  ;;  %796 = vmatmul.bf16.vlgmr.msrb.gmra.mxu1 %v773_v18 }
 0x26b   :  { %809 = vmatmul.bf16.vlgmr.msrb.gmra.mxu2 %v773_v18  ;;  %1007 = vmatpush.bf16.msrb.mxu0 %v1907_v40 }
 0x26c   :  { %1085 = vmatpush.bf16.msrb.mxu1 %v1874_v7  ;;  %1098 = vmatpush.bf16.msrb.mxu2 %v1897_v29 }
 0x26f   :  { %1008 = vmatpush.bf16.msrb.mxu0 %v1917_v50 }
 0x270   :  { %1086 = vmatpush.bf16.msrb.mxu1 %v1877_v13  ;;  %1099 = vmatpush.bf16.msrb.mxu2 %v1911_v41 }
 0x273   :  { %1009 = vmatpush.bf16.msrb.mxu0 %v1925_v60 }
 0x274   :  { %1087 = vmatpush.bf16.msrb.mxu1 %v1880_v25  ;;  %1100 = vmatpush.bf16.msrb.mxu2 %v1920_v51 }
 0x277   :  { %1010 = vmatpush.bf16.msrb.mxu0 %v1932_v5 }
 0x278   :  { %1088 = vmatpush.bf16.msrb.mxu1 %v1883_v34  ;;  %1101 = vmatpush.bf16.msrb.mxu2 %v1928_v61 }
 0x27b   :  { %1011 = vmatpush.bf16.msrb.mxu0 %v1939_v15 }
 0x27c   :  { %1089 = vmatpush.bf16.msrb.mxu1 %v1886_v45  ;;  %1102 = vmatpush.bf16.msrb.mxu2 %v1935_v6 }
 0x27f   :  { %1012 = vmatpush.bf16.msrb.mxu0 %v1947_v21 }
 0x280   :  { %1090 = vmatpush.bf16.msrb.mxu1 %v1889_v59  ;;  %1103 = vmatpush.bf16.msrb.mxu2 %v1942_v16 }
 0x283   :  { %1013 = vmatpush.bf16.msrb.mxu0 %v1956_v31 }
 0x284   :  { %1091 = vmatpush.bf16.msrb.mxu1 %v1892_v12  ;;  %1104 = vmatpush.bf16.msrb.mxu2 %v1951_v22 }
 0x287   :  { %1014 = vmatpush.bf16.msrb.mxu0 %v1964_v36 }
 0x288   :  { %1092 = vmatpush.bf16.msrb.mxu1 %v1895_v28  ;;  %1105 = vmatpush.bf16.msrb.mxu2 %v1959_v32 }
 0x2e7   :  { %v784_v9 = vpop.f32.mrf.mxu0  ;;  %v797_v43 = vpop.f32.mrf.mxu1 }
 0x2e8   :  { %v785_v19 = vadd.f32 %v784_v9, %v2027_v44  ;;  %v798_v30 = vadd.f32 %v797_v43, %v2033_v63 }
 0x2ea   :  { %v815_v20 = vrot.slane %v785_v19, 5  ;;  %v838_v23 = vrot.slane %v798_v30, 5 }
 0x2ec   :  { %v817_v26 = vadd.f32 %v815_v20, %v2029_v46  ;;  %v840_v27 = vadd.f32 %v838_v23, %v2035_v0 }
 0x2ee   :  { %v1518_v33 = vmul.f32 -1.442695, %v817_v26  ;;  %v1519_v35 = vmul.f32 -1.442695, %v840_v27  ;;  %v810_v38 = vpop.f32.mrf.mxu2 }
 0x2ef   :  { %v786_v42 = vpop.f32.mrf.mxu0  ;;  %v799_v47 = vpop.f32.mrf.mxu1  ;;  %v811_v3 = vadd.f32 %v810_v38, %v2039_v24 }
 0x2f0   :  { %1614 = vpow2.f32 %v1518_v33  ;;  %v869_v42 = vrot.slane %v2116_v10, 7 }
 0x2f1   :  { %1616 = vpow2.f32 %v1519_v35  ;;  %v861_v9 = vrot.slane %v811_v3, 5 }
 0x2f6   :  { %v1615_v48 = vpop.eup %1614  ;;  %v812_v52 = vpop.f32.mrf.mxu2 }
 0x2f7   :  { %v1617_v53 = vpop.eup %1616  ;;  %v821_v39 = vadd.f32 1.0, %v1615_v48 }
 0x2f8   :  { %v844_v54 = vadd.f32 1.0, %v1617_v53 }
 0x2f9   :  { %1618 = vrcp.f32 %v821_v39  ;;  %v833_v37 = vand.u32 2147483648, %v821_v39  ;;  %v831_v4 = vand.u32 2147483647, %v821_v39  ;;  %vm827_vm11 = vweird.f32 %v821_v39 }
 0x2fa   :  { %1620 = vrcp.f32 %v844_v54  ;;  %v856_v30 = vand.u32 2147483648, %v844_v54  ;;  %vm850_vm15 = vweird.f32 %v844_v54  ;;  %v854_v23 = vand.u32 2147483647, %v844_v54 }
 0x2fb   :  { %v834_v14 = vor.u32 1.1754944e-38, %v833_v37  ;;  %vm832_vm13 = vcmp.eq.f32.partialorder %v831_v4, 8.507059e+37 }
 0x2fc   :  { %v857_v33 = vor.u32 1.1754944e-38, %v856_v30  ;;  %vm855_vm1 = vcmp.eq.f32.partialorder %v854_v23, 8.507059e+37 }
 0x2ff   :  { %v1619_v55 = vpop.eup %1618 }
 0x300   :  { %v1621_v56 = vpop.eup %1620  ;;  %v823_v57 = vmul.f32 %v1619_v55, %v821_v39  ;;  %vm828_vm10 = vweird.f32 %v1619_v55 }
 0x301   :  { %v846_v62 = vmul.f32 %v1621_v56, %v844_v54  ;;  %vm829_vm12 = vmor %vm827_vm11, %vm828_vm10  ;;  %vm851_vm14 = vweird.f32 %v1621_v56  ;;  %vm1292_vm11 = vcmask 1043456  }
 0x302   :  { %v824_v1 = vsub.f32 1.0, %v823_v57  ;;  %vm852_vm0 = vmor %vm850_vm15, %vm851_vm14 }
 0x303   :  { %v847_v2 = vsub.f32 1.0, %v846_v62 }
 0x304   :  { %v825_v58 = vmul.f32 %v1619_v55, %v824_v1 }
 0x305   :  { %v848_v8 = vmul.f32 %v1621_v56, %v847_v2 }
 0x306   :  { %v826_v11 = vadd.f32 %v1619_v55, %v825_v58 }
 0x307   :  { %v849_v19 = vadd.f32 %v1621_v56, %v848_v8 }
 0x308   :  { %v830_v18 = vsel %vm829_vm12, %v1619_v55, %v826_v11 }
 0x309   :  { %v835_v43 = vsel %vm832_vm13, %v834_v14, %v830_v18  ;;  %v853_v27 = vsel %vm852_vm0, %v1621_v56, %v849_v19 }
 0x30a   :  { %v863_v20 = vmul.f32 %v861_v9, %v835_v43  ;;  %v858_v35 = vsel %vm855_vm1, %v857_v33, %v853_v27 }
 0x30b   :  { %v866_v38 = vsub.f32 1.0, %v858_v35  ;;  %v871_v52 = vmul.f32 %v869_v42, %v858_v35 }
 0x30c   :  { %v864_v26 = vadd.f32 %v863_v20, %v2042_v49 }
 0x30e   :  { %1622 = vtanh.f32 %v864_v26 }
 0x314   :  { %v1623_v47 = vpop.eup %1622 }
 0x315   :  { %v867_v48 = vmul.f32 %v1623_v47, %v866_v38 }
 0x317   :  { %v2156_v53 = vadd.f32 %v871_v52, %v867_v48 }
 0x319   :  { %v873_v39 = vpack.c.bf16 %v2156_v53, %v2156_v53  ;;  %v2162_v54 = vsel %vm1290_vm2, %v2123_v17, %v2156_v53  ;;  %v973_v48 = vrot.slane %v2156_v53, 7 }
 0x31b   :  { %v875_v55 = vshrl.u32 %v873_v39, 16 }
 0x31d   :  { %v877_v56 = vrot.slane %v875_v55, 1 }
 0x31f   :  { %887 = vmatmul.bf16.vlgmr.msrb.gmra.mxu3 %v877_v56  ;;  %900 = vmatmul.bf16.vlgmr.msra.gmra.mxu0 %v877_v56 }
 0x320   :  { %913 = vmatmul.bf16.vlgmr.msra.gmra.mxu1 %v877_v56  ;;  %1111 = vmatpush.bf16.msrb.mxu3 %v1907_v40 }
 0x321   :  { %1187 = vmatpush.bf16.msra.mxu0 %v1874_v7  ;;  %1200 = vmatpush.bf16.msra.mxu1 %v1897_v29 }
 0x324   :  { %1112 = vmatpush.bf16.msrb.mxu3 %v1917_v50 }
 0x325   :  { %1188 = vmatpush.bf16.msra.mxu0 %v1877_v13  ;;  %1201 = vmatpush.bf16.msra.mxu1 %v1911_v41 }
 0x328   :  { %1113 = vmatpush.bf16.msrb.mxu3 %v1925_v60 }
 0x329   :  { %1189 = vmatpush.bf16.msra.mxu0 %v1880_v25  ;;  %1202 = vmatpush.bf16.msra.mxu1 %v1920_v51 }
 0x32c   :  { %1114 = vmatpush.bf16.msrb.mxu3 %v1932_v5 }
 0x32d   :  { %1190 = vmatpush.bf16.msra.mxu0 %v1883_v34  ;;  %1203 = vmatpush.bf16.msra.mxu1 %v1928_v61 }
 0x330   :  { %1115 = vmatpush.bf16.msrb.mxu3 %v1939_v15 }
 0x331   :  { %1191 = vmatpush.bf16.msra.mxu0 %v1886_v45  ;;  %1204 = vmatpush.bf16.msra.mxu1 %v1935_v6 }
 0x334   :  { %1116 = vmatpush.bf16.msrb.mxu3 %v1947_v21 }
 0x335   :  { %1192 = vmatpush.bf16.msra.mxu0 %v1889_v59  ;;  %1205 = vmatpush.bf16.msra.mxu1 %v1942_v16 }
 0x338   :  { %1117 = vmatpush.bf16.msrb.mxu3 %v1956_v31 }
 0x339   :  { %1193 = vmatpush.bf16.msra.mxu0 %v1892_v12  ;;  %1206 = vmatpush.bf16.msra.mxu1 %v1951_v22 }
 0x33c   :  { %1118 = vmatpush.bf16.msrb.mxu3 %v1964_v36 }
 0x33d   :  { %1194 = vmatpush.bf16.msra.mxu0 %v1895_v28  ;;  %1207 = vmatpush.bf16.msra.mxu1 %v1959_v32 }
 0x39c   :  { %v901_v7 = vpop.f32.mrf.mxu0 }
 0x39d   :  { %v902_v13 = vadd.f32 %v901_v7, %v2033_v63  ;;  %v914_v25 = vpop.f32.mrf.mxu1 }
 0x39e   :  { %v915_v4 = vadd.f32 %v914_v25, %v2039_v24 }
 0x39f   :  { %v942_v34 = vrot.slane %v902_v13, 4 }
 0x3a0   :  { %v965_v43 = vrot.slane %v915_v4, 4 }
 0x3a1   :  { %v944_v45 = vadd.f32 %v942_v34, %v2035_v0 }
 0x3a2   :  { %v888_v59 = vpop.f32.mrf.mxu3 }
 0x3a3   :  { %v1521_v29 = vmul.f32 -1.442695, %v944_v45  ;;  %v889_v41 = vadd.f32 %v888_v59, %v2027_v44 }
 0x3a4   :  { %v903_v12 = vpop.f32.mrf.mxu0 }
 0x3a5   :  { %1624 = vpow2.f32 %v1521_v29  ;;  %v919_v51 = vrot.slane %v889_v41, 4  ;;  %v916_v61 = vpop.f32.mrf.mxu1 }
 0x3a7   :  { %v921_v6 = vadd.f32 %v919_v51, %v2029_v46 }
 0x3a9   :  { %v1520_v28 = vmul.f32 -1.442695, %v921_v6 }
 0x3aa   :  { %v890_v16 = vpop.f32.mrf.mxu3 }
 0x3ab   :  { %v1625_v22 = vpop.eup %1624  ;;  %1626 = vpow2.f32 %v1520_v28 }
 0x3ac   :  { %v948_v32 = vadd.f32 1.0, %v1625_v22 }
 0x3ae   :  { %1628 = vrcp.f32 %v948_v32  ;;  %v960_v23 = vand.u32 2147483648, %v948_v32  ;;  %vm954_vm8 = vweird.f32 %v948_v32  ;;  %v958_v27 = vand.u32 2147483647, %v948_v32 }
 0x3b0   :  { %v961_v38 = vor.u32 1.1754944e-38, %v960_v23  ;;  %vm959_vm10 = vcmp.eq.f32.partialorder %v958_v27, 8.507059e+37 }
 0x3b1   :  { %v1627_v10 = vpop.eup %1626 }
 0x3b2   :  { %v925_v17 = vadd.f32 1.0, %v1627_v10 }
 0x3b4   :  { %1630 = vrcp.f32 %v925_v17  ;;  %v1629_v57 = vpop.eup %1628  ;;  %v937_v58 = vand.u32 2147483648, %v925_v17  ;;  %v935_v11 = vand.u32 2147483647, %v925_v17  ;;  %vm931_vm4 = vweird.f32 %v925_v17 }
 0x3b5   :  { %v950_v62 = vmul.f32 %v1629_v57, %v948_v32  ;;  %vm955_vm7 = vweird.f32 %v1629_v57 }
 0x3b6   :  { %v938_v9 = vor.u32 1.1754944e-38, %v937_v58  ;;  %vm936_vm6 = vcmp.eq.f32.partialorder %v935_v11, 8.507059e+37  ;;  %vm956_vm9 = vmor %vm954_vm8, %vm955_vm7 }
 0x3b7   :  { %v951_v37 = vsub.f32 1.0, %v950_v62 }
 0x3b9   :  { %v952_v14 = vmul.f32 %v1629_v57, %v951_v37 }
 0x3ba   :  { %v1631_v1 = vpop.eup %1630 }
 0x3bb   :  { %v927_v2 = vmul.f32 %v1631_v1, %v925_v17  ;;  %vm932_vm3 = vweird.f32 %v1631_v1  ;;  %v953_v20 = vadd.f32 %v1629_v57, %v952_v14 }
 0x3bc   :  { %vm933_vm5 = vmor %vm931_vm4, %vm932_vm3  ;;  %vm1294_vm4 = vcmask 1044480  }
 0x3bd   :  { %v928_v3 = vsub.f32 1.0, %v927_v2  ;;  %v957_v35 = vsel %vm956_vm9, %v1629_v57, %v953_v20 }
 0x3be   :  { %v962_v42 = vsel %vm959_vm10, %v961_v38, %v957_v35 }
 0x3bf   :  { %v929_v8 = vmul.f32 %v1631_v1, %v928_v3  ;;  %v970_v47 = vsub.f32 1.0, %v962_v42  ;;  %v975_v55 = vmul.f32 %v973_v48, %v962_v42 }
 0x3c1   :  { %v930_v18 = vadd.f32 %v1631_v1, %v929_v8 }
 0x3c3   :  { %v934_v19 = vsel %vm933_vm5, %v1631_v1, %v930_v18 }
 0x3c4   :  { %v939_v30 = vsel %vm936_vm6, %v938_v9, %v934_v19 }
 0x3c5   :  { %v967_v26 = vmul.f32 %v965_v43, %v939_v30 }
 0x3c7   :  { %v968_v33 = vadd.f32 %v967_v26, %v2042_v49 }
 0x3c9   :  { %1632 = vtanh.f32 %v968_v33 }
 0x3cf   :  { %v1633_v52 = vpop.eup %1632 }
 0x3d0   :  { %v971_v39 = vmul.f32 %v1633_v52, %v970_v47 }
 0x3d2   :  { %v2195_v56 = vadd.f32 %v975_v55, %v971_v39 }
 0x3d4   :  { %v977_v7 = vpack.c.bf16 %v2195_v56, %v2195_v56  ;;  %v2201_v13 = vsel %vm1292_vm11, %v2162_v54, %v2195_v56  ;;  %v1075_v26 = vrot.slane %v2195_v56, 7 }
 0x3d6   :  { %v979_v25 = vrot.slane %v977_v7, 2 }
 0x3d8   :  { %989 = vmatmul.bf16.vlgmr.msra.gmra.mxu2 %v979_v25  ;;  %1002 = vmatmul.bf16.vlgmr.msra.gmra.mxu3 %v979_v25 }
 0x3d9   :  { %1015 = vmatmul.bf16.vlgmr.msrb.gmra.mxu0 %v979_v25  ;;  %1213 = vmatpush.bf16.msra.mxu2 %v1907_v40 }
 0x3dd   :  { %1214 = vmatpush.bf16.msra.mxu2 %v1917_v50 }
 0x3e1   :  { %1215 = vmatpush.bf16.msra.mxu2 %v1925_v60 }
 0x3e5   :  { %1216 = vmatpush.bf16.msra.mxu2 %v1932_v5 }
 0x3e9   :  { %1217 = vmatpush.bf16.msra.mxu2 %v1939_v15 }
 0x3ed   :  { %1218 = vmatpush.bf16.msra.mxu2 %v1947_v21 }
 0x3f1   :  { %1219 = vmatpush.bf16.msra.mxu2 %v1956_v31 }
 0x3f5   :  { %1220 = vmatpush.bf16.msra.mxu2 %v1964_v36 }
 0x456   :  { %v1016_v53 = vpop.f32.mrf.mxu0 }
 0x457   :  { %v1017_v57 = vadd.f32 %v1016_v53, %v2039_v24 }
 0x459   :  { %v1067_v58 = vrot.slane %v1017_v57, 3 }
 0x45b   :  { %v990_v54 = vpop.f32.mrf.mxu2  ;;  %v1003_v34 = vpop.f32.mrf.mxu3 }
 0x45c   :  { %v991_v45 = vadd.f32 %v990_v54, %v2027_v44  ;;  %v1004_v40 = vadd.f32 %v1003_v34, %v2033_v63 }
 0x45e   :  { %v1021_v50 = vrot.slane %v991_v45, 3  ;;  %v1044_v59 = vrot.slane %v1004_v40, 3  ;;  %v1018_v60 = vpop.f32.mrf.mxu0 }
 0x460   :  { %v1023_v5 = vadd.f32 %v1021_v50, %v2029_v46  ;;  %v1046_v15 = vadd.f32 %v1044_v59, %v2035_v0 }
 0x462   :  { %v1522_v29 = vmul.f32 -1.442695, %v1023_v5  ;;  %v1523_v21 = vmul.f32 -1.442695, %v1046_v15 }
 0x463   :  { %v992_v41 = vpop.f32.mrf.mxu2  ;;  %v1005_v31 = vpop.f32.mrf.mxu3 }
 0x464   :  { %1634 = vpow2.f32 %v1522_v29 }
 0x465   :  { %1636 = vpow2.f32 %v1523_v21 }
 0x46a   :  { %v1635_v36 = vpop.eup %1634 }
 0x46b   :  { %v1637_v12 = vpop.eup %1636  ;;  %v1027_v51 = vadd.f32 1.0, %v1635_v36 }
 0x46c   :  { %v1050_v61 = vadd.f32 1.0, %v1637_v12 }
 0x46d   :  { %1638 = vrcp.f32 %v1027_v51  ;;  %v1039_v10 = vand.u32 2147483648, %v1027_v51  ;;  %v1037_v1 = vand.u32 2147483647, %v1027_v51  ;;  %vm1033_vm13 = vweird.f32 %v1027_v51 }
 0x46e   :  { %1640 = vrcp.f32 %v1050_v61  ;;  %v1062_v18 = vand.u32 2147483648, %v1050_v61  ;;  %vm1056_vm1 = vweird.f32 %v1050_v61  ;;  %v1060_v9 = vand.u32 2147483647, %v1050_v61 }
 0x46f   :  { %v1040_v3 = vor.u32 1.1754944e-38, %v1039_v10  ;;  %vm1038_vm15 = vcmp.eq.f32.partialorder %v1037_v1, 8.507059e+37 }
 0x470   :  { %v1063_v30 = vor.u32 1.1754944e-38, %v1062_v18  ;;  %vm1061_vm3 = vcmp.eq.f32.partialorder %v1060_v9, 8.507059e+37 }
 0x473   :  { %v1639_v6 = vpop.eup %1638 }
 0x474   :  { %v1641_v28 = vpop.eup %1640  ;;  %v1029_v16 = vmul.f32 %v1639_v6, %v1027_v51  ;;  %vm1034_vm12 = vweird.f32 %v1639_v6 }
 0x475   :  { %v1052_v22 = vmul.f32 %v1641_v28, %v1050_v61  ;;  %vm1035_vm14 = vmor %vm1033_vm13, %vm1034_vm12  ;;  %vm1057_vm0 = vweird.f32 %v1641_v28  ;;  %vm1296_vm13 = vcmask 1045504  }
 0x476   :  { %v1030_v32 = vsub.f32 1.0, %v1029_v16  ;;  %vm1058_vm2 = vmor %vm1056_vm1, %vm1057_vm0 }
 0x477   :  { %v1053_v17 = vsub.f32 1.0, %v1052_v22 }
 0x478   :  { %v1031_v62 = vmul.f32 %v1639_v6, %v1030_v32 }
 0x479   :  { %v1054_v2 = vmul.f32 %v1641_v28, %v1053_v17 }
 0x47a   :  { %v1032_v37 = vadd.f32 %v1639_v6, %v1031_v62 }
 0x47b   :  { %v1055_v11 = vadd.f32 %v1641_v28, %v1054_v2 }
 0x47c   :  { %v1036_v4 = vsel %vm1035_vm14, %v1639_v6, %v1032_v37 }
 0x47d   :  { %v1041_v8 = vsel %vm1038_vm15, %v1040_v3, %v1036_v4  ;;  %v1059_v19 = vsel %vm1058_vm2, %v1641_v28, %v1055_v11 }
 0x47e   :  { %v1069_v14 = vmul.f32 %v1067_v58, %v1041_v8  ;;  %v1064_v20 = vsel %vm1061_vm3, %v1063_v30, %v1059_v19 }
 0x47f   :  { %v1072_v23 = vsub.f32 1.0, %v1064_v20  ;;  %v1077_v35 = vmul.f32 %v1075_v26, %v1064_v20 }
 0x480   :  { %v1070_v43 = vadd.f32 %v1069_v14, %v2042_v49 }
 0x482   :  { %1642 = vtanh.f32 %v1070_v43 }
 0x488   :  { %v1643_v27 = vpop.eup %1642 }
 0x489   :  { %v1073_v33 = vmul.f32 %v1643_v27, %v1072_v23 }
 0x48b   :  { %v2218_v38 = vadd.f32 %v1077_v35, %v1073_v33 }
 0x48d   :  { %v1079_v42 = vpack.c.bf16 %v2218_v38, %v2218_v38  ;;  %v2224_v47 = vsel %vm1294_vm4, %v2201_v13, %v2218_v38  ;;  %v1179_v9 = vrot.slane %v2218_v38, 7 }
 0x48f   :  { %v1081_v48 = vshrl.u32 %v1079_v42, 16 }
 0x491   :  { %v1083_v52 = vrot.slane %v1081_v48, 2 }
 0x493   :  { %1093 = vmatmul.bf16.vlgmr.msrb.gmra.mxu1 %v1083_v52  ;;  %1106 = vmatmul.bf16.vlgmr.msrb.gmra.mxu2 %v1083_v52 }
 0x494   :  { %1119 = vmatmul.bf16.vlgmr.msrb.gmra.mxu3 %v1083_v52 }
 0x510   :  { %v1094_v39 = vpop.f32.mrf.mxu1 }
 0x511   :  { %v1095_v55 = vadd.f32 %v1094_v39, %v2027_v44 }
 0x513   :  { %v1125_v56 = vrot.slane %v1095_v55, 2 }
 0x515   :  { %v1127_v7 = vadd.f32 %v1125_v56, %v2029_v46 }
 0x516   :  { %v1107_v25 = vpop.f32.mrf.mxu2 }
 0x517   :  { %v1524_v53 = vmul.f32 -1.442695, %v1127_v7  ;;  %v1108_v54 = vadd.f32 %v1107_v25, %v2033_v63  ;;  %v1120_v34 = vpop.f32.mrf.mxu3 }
 0x518   :  { %v1096_v45 = vpop.f32.mrf.mxu1  ;;  %v1121_v51 = vadd.f32 %v1120_v34, %v2039_v24 }
 0x519   :  { %1644 = vpow2.f32 %v1524_v53  ;;  %v1148_v13 = vrot.slane %v1108_v54, 2 }
 0x51a   :  { %v1171_v57 = vrot.slane %v1121_v51, 2 }
 0x51b   :  { %v1150_v40 = vadd.f32 %v1148_v13, %v2035_v0 }
 0x51d   :  { %v1525_v50 = vmul.f32 -1.442695, %v1150_v40 }
 0x51e   :  { %v1109_v59 = vpop.f32.mrf.mxu2 }
 0x51f   :  { %v1645_v60 = vpop.eup %1644  ;;  %1646 = vpow2.f32 %v1525_v50  ;;  %v1122_v5 = vpop.f32.mrf.mxu3 }
 0x520   :  { %v1131_v15 = vadd.f32 1.0, %v1645_v60 }
 0x522   :  { %1648 = vrcp.f32 %v1131_v15  ;;  %v1143_v12 = vand.u32 2147483648, %v1131_v15  ;;  %v1141_v6 = vand.u32 2147483647, %v1131_v15  ;;  %vm1137_vm6 = vweird.f32 %v1131_v15 }
 0x524   :  { %v1144_v32 = vor.u32 1.1754944e-38, %v1143_v12  ;;  %vm1142_vm8 = vcmp.eq.f32.partialorder %v1141_v6, 8.507059e+37 }
 0x525   :  { %v1647_v29 = vpop.eup %1646 }
 0x526   :  { %v1154_v21 = vadd.f32 1.0, %v1647_v29 }
 0x528   :  { %v1649_v41 = vpop.eup %1648  ;;  %1650 = vrcp.f32 %v1154_v21  ;;  %v1166_v2 = vand.u32 2147483648, %v1154_v21  ;;  %v1164_v3 = vand.u32 2147483647, %v1154_v21  ;;  %vm1160_vm10 = vweird.f32 %v1154_v21 }
 0x529   :  { %v1133_v31 = vmul.f32 %v1649_v41, %v1131_v15  ;;  %vm1138_vm5 = vweird.f32 %v1649_v41 }
 0x52a   :  { %vm1139_vm7 = vmor %vm1137_vm6, %vm1138_vm5  ;;  %v1167_v8 = vor.u32 1.1754944e-38, %v1166_v2  ;;  %vm1165_vm12 = vcmp.eq.f32.partialorder %v1164_v3, 8.507059e+37  ;;  %vm1298_vm6 = vcmask 1046528  }
 0x52b   :  { %v1134_v36 = vsub.f32 1.0, %v1133_v31 }
 0x52d   :  { %v1135_v61 = vmul.f32 %v1649_v41, %v1134_v36 }
 0x52e   :  { %v1651_v28 = vpop.eup %1650 }
 0x52f   :  { %v1156_v16 = vmul.f32 %v1651_v28, %v1154_v21  ;;  %v1136_v22 = vadd.f32 %v1649_v41, %v1135_v61  ;;  %vm1161_vm9 = vweird.f32 %v1651_v28 }
 0x530   :  { %vm1162_vm11 = vmor %vm1160_vm10, %vm1161_vm9 }
 0x531   :  { %v1157_v10 = vsub.f32 1.0, %v1156_v16  ;;  %v1140_v17 = vsel %vm1139_vm7, %v1649_v41, %v1136_v22 }
 0x532   :  { %v1145_v62 = vsel %vm1142_vm8, %v1144_v32, %v1140_v17 }
 0x533   :  { %v1158_v1 = vmul.f32 %v1651_v28, %v1157_v10  ;;  %v1173_v37 = vmul.f32 %v1171_v57, %v1145_v62 }
 0x535   :  { %v1159_v58 = vadd.f32 %v1651_v28, %v1158_v1  ;;  %v1174_v4 = vadd.f32 %v1173_v37, %v2042_v49 }
 0x537   :  { %v1163_v11 = vsel %vm1162_vm11, %v1651_v28, %v1159_v58  ;;  %1652 = vtanh.f32 %v1174_v4 }
 0x538   :  { %v1168_v14 = vsel %vm1165_vm12, %v1167_v8, %v1163_v11 }
 0x539   :  { %v1176_v18 = vsub.f32 1.0, %v1168_v14  ;;  %v1181_v30 = vmul.f32 %v1179_v9, %v1168_v14 }
 0x53d   :  { %v1653_v43 = vpop.eup %1652 }
 0x53e   :  { %v1177_v19 = vmul.f32 %v1653_v43, %v1176_v18 }
 0x540   :  { %v2233_v20 = vadd.f32 %v1181_v30, %v1177_v19 }
 0x542   :  { %v1183_v23 = vpack.c.bf16 %v2233_v20, %v2233_v20  ;;  %v2239_v26 = vsel %vm1296_vm13, %v2224_v47, %v2233_v20  ;;  %v1281_v57 = vrot.slane %v2233_v20, 7 }
 0x544   :  { %v1185_v27 = vrot.slane %v1183_v23, 3 }
 0x546   :  { %1195 = vmatmul.bf16.vlgmr.msra.gmra.mxu0 %v1185_v27  ;;  %1208 = vmatmul.bf16.vlgmr.msra.gmra.mxu1 %v1185_v27 }
 0x547   :  { %1221 = vmatmul.bf16.vlgmr.msra.gmra.mxu2 %v1185_v27 }
 0x5c3   :  { %v1196_v33 = vpop.f32.mrf.mxu0  ;;  %v1209_v35 = vpop.f32.mrf.mxu1 }
 0x5c4   :  { %v1197_v38 = vadd.f32 %v1196_v33, %v2027_v44  ;;  %v1210_v42 = vadd.f32 %v1209_v35, %v2033_v63 }
 0x5c6   :  { %v1227_v48 = vrot.slane %v1197_v38, 1  ;;  %v1250_v52 = vrot.slane %v1210_v42, 1 }
 0x5c8   :  { %v1229_v39 = vadd.f32 %v1227_v48, %v2029_v46  ;;  %v1252_v55 = vadd.f32 %v1250_v52, %v2035_v0 }
 0x5ca   :  { %v1526_v56 = vmul.f32 -1.442695, %v1229_v39  ;;  %v1527_v7 = vmul.f32 -1.442695, %v1252_v55  ;;  %v1222_v47 = vpop.f32.mrf.mxu2 }
 0x5cb   :  { %v1198_v25 = vpop.f32.mrf.mxu0  ;;  %v1211_v53 = vpop.f32.mrf.mxu1  ;;  %v1223_v5 = vadd.f32 %v1222_v47, %v2039_v24 }
 0x5cc   :  { %1654 = vpow2.f32 %v1526_v56 }
 0x5cd   :  { %1656 = vpow2.f32 %v1527_v7  ;;  %v1273_v12 = vrot.slane %v1223_v5, 1 }
 0x5d2   :  { %v1655_v54 = vpop.eup %1654  ;;  %v1224_v34 = vpop.f32.mrf.mxu2 }
 0x5d3   :  { %v1657_v45 = vpop.eup %1656  ;;  %v1233_v13 = vadd.f32 1.0, %v1655_v54 }
 0x5d4   :  { %v1256_v44 = vadd.f32 1.0, %v1657_v45 }
 0x5d5   :  { %1658 = vrcp.f32 %v1233_v13  ;;  %v1245_v60 = vand.u32 2147483648, %v1233_v13  ;;  %v1243_v29 = vand.u32 2147483647, %v1233_v13  ;;  %vm1239_vm15 = vweird.f32 %v1233_v13 }
 0x5d6   :  { %1660 = vrcp.f32 %v1256_v44  ;;  %v1268_v28 = vand.u32 2147483648, %v1256_v44  ;;  %vm1262_vm3 = vweird.f32 %v1256_v44  ;;  %v1266_v16 = vand.u32 2147483647, %v1256_v44 }
 0x5d7   :  { %v1246_v31 = vor.u32 1.1754944e-38, %v1245_v60  ;;  %vm1244_vm1 = vcmp.eq.f32.partialorder %v1243_v29, 8.507059e+37 }
 0x5d8   :  { %v1269_v32 = vor.u32 1.1754944e-38, %v1268_v28  ;;  %vm1267_vm5 = vcmp.eq.f32.partialorder %v1266_v16, 8.507059e+37 }
 0x5db   :  { %v1659_v63 = vpop.eup %1658 }
 0x5dc   :  { %v1661_v40 = vpop.eup %1660  ;;  %v1235_v50 = vmul.f32 %v1659_v63, %v1233_v13  ;;  %vm1240_vm14 = vweird.f32 %v1659_v63 }
 0x5dd   :  { %v1258_v46 = vmul.f32 %v1661_v40, %v1256_v44  ;;  %vm1241_vm0 = vmor %vm1239_vm15, %vm1240_vm14  ;;  %vm1263_vm2 = vweird.f32 %v1661_v40 }
 0x5de   :  { %v1236_v59 = vsub.f32 1.0, %v1235_v50  ;;  %vm1264_vm4 = vmor %vm1262_vm3, %vm1263_vm2 }
 0x5df   :  { %v1259_v0 = vsub.f32 1.0, %v1258_v46 }
 0x5e0   :  { %v1237_v15 = vmul.f32 %v1659_v63, %v1236_v59 }
 0x5e1   :  { %v1260_v21 = vmul.f32 %v1661_v40, %v1259_v0 }
 0x5e2   :  { %v1238_v41 = vadd.f32 %v1659_v63, %v1237_v15 }
 0x5e3   :  { %v1261_v61 = vadd.f32 %v1661_v40, %v1260_v21 }
 0x5e4   :  { %v1242_v36 = vsel %vm1241_vm0, %v1659_v63, %v1238_v41 }
 0x5e5   :  { %v1247_v51 = vsel %vm1244_vm1, %v1246_v31, %v1242_v36  ;;  %v1265_v22 = vsel %vm1264_vm4, %v1661_v40, %v1261_v61 }
 0x5e6   :  { %v1275_v6 = vmul.f32 %v1273_v12, %v1247_v51  ;;  %v1270_v10 = vsel %vm1267_vm5, %v1269_v32, %v1265_v22 }
 0x5e7   :  { %v1278_v17 = vsub.f32 1.0, %v1270_v10  ;;  %v1283_v2 = vmul.f32 %v1281_v57, %v1270_v10 }
 0x5e8   :  { %v1276_v24 = vadd.f32 %v1275_v6, %v2042_v49 }
 0x5ea   :  { %1662 = vtanh.f32 %v1276_v24 }
 0x5f0   :  { %v1663_v62 = vpop.eup %1662 }
 0x5f1   :  { %v1279_v1 = vmul.f32 %v1663_v62, %v1278_v17 }
 0x5f3   :  { %v1284_v49 = vadd.f32 %v1283_v2, %v1279_v1 }
 0x5f5   :  { %1285 = vst [vmem:[#allocation2 - $0x7] sm:$0x80] %v1284_v49  ;;  %v1299_v37 = vsel %vm1298_vm6, %v2239_v26, %v1284_v49 }
 0x5f6   :  { %1300 = vst [vmem:[#allocation12] sm:$0xff] %v1299_v37 }
 0x5f7   :  { %1311 = dma.vmem_to_hbm [thread:$0]  %s1307_s21, 128, %s1309_s24, [#allocation5]  }
 0x5f8   :  { %1814 = dma.done.wait [#allocation5], 128  }
 0x5f9   :  { %1815 = vsyncadd [#allocation5], 4294967168 }
 0x5fa   :  { %1316 = vsyncpa [#allocation4], 1 }
 0x5fb   :  { %1317 = vsyncpa [#allocation7], 1 }
 0x5fc   :  { %1318 = vsyncpa [#allocation10], 1 }
 0x5fd   :  { %1319 = vsyncpa [#allocation5], 1 }

</bundles_post_ra>
